<compile_context>
chip_gen: v7x
topology: tpu7x:2x2x1
jax: 0.10.0
libtpu: 0.0.40
codegen_flags: <defaults>
</compile_context>

<pallas_src>
import jax
import jax.numpy as jnp
from jax.experimental import pallas as pl
from jax.experimental.pallas import tpu as pltpu

LEAKY_SLOPE = 0.01
BN_EPS = 1e-5


def _round_up(v, m):
    return ((v + m - 1) // m) * m


# ---------------------------------------------------------------------------
# Wrapper: NCHW in, NCHW out (matches the PyTorch module forward).
# ---------------------------------------------------------------------------
def conv_up_bn_relu(x_nchw, weight_oihw, bias, gamma, beta, stride=1):
    N, Cin, H, W = x_nchw.shape
    Cout = weight_oihw.shape[0]
    Hu, Wu = H * stride, W * stride
    Hp, Wp = Hu + 2, Wu + 2
    L = Hp * Wp                     # flattened padded spatial size per image
    NL = N * L                      # fused lane extent (batch folded into lanes)
    cpt = _round_up(Cin, 8)         # slab rows per tap (8-sublane aligned)
    KP = 9 * cpt
    inv_cnt = 1.0 / float(N * Hu * Wu)

    # ---- XLA glue (layout only): nearest upsample, zero pad, flatten -------
    x = x_nchw
    if stride != 1:
        x = jnp.repeat(jnp.repeat(x, stride, axis=2), stride, axis=3)
    xpad = jnp.pad(x, ((0, 0), (0, 0), (1, 1), (1, 1)))            # (N,Cin,Hp,Wp)
    xflat = jnp.transpose(xpad, (1, 0, 2, 3)).reshape(Cin, NL)     # (Cin, N*L)
    # Tail pad so every tap window [off, off+NL) stays in bounds (max off=2*Wp+2).
    Lx = _round_up(NL + 2 * Wp + 2, 128)
    xflat = jnp.pad(xflat, ((0, 0), (0, Lx - NL))).astype(jnp.bfloat16)

    # Conv weight OIHW -> (Cout, KP): per-tap column blocks of width cpt,
    # zero padded beyond Cin (matching the zeroed slab rows).
    w9 = jnp.transpose(weight_oihw, (2, 3, 0, 1)).reshape(9, Cout, Cin)
    w2 = jnp.zeros((Cout, 9, cpt), jnp.float32)
    w2 = w2.at[:, :, :Cin].set(jnp.transpose(w9, (1, 0, 2)))
    w2 = w2.reshape(Cout, KP).astype(jnp.bfloat16)

    b2 = bias.reshape(Cout, 1).astype(jnp.float32)
    g2 = gamma.reshape(Cout, 1).astype(jnp.float32)
    be2 = beta.reshape(Cout, 1).astype(jnp.float32)

    # Lane-validity mask: lane j = n*L + ho*Wp + wo is a real output pixel iff
    # ho < Hu and wo < Wu; remaining lanes are pad/wrap garbage that must not
    # contribute to the BatchNorm statistics.
    r = jnp.arange(NL) % L
    mask = (((r // Wp) < Hu) & ((r % Wp) < Wu)).astype(jnp.float32).reshape(1, NL)

    def kernel(x_ref, w_ref, b_ref, g_ref, beta_ref, m_ref, out_ref, slab_ref):
        # In-kernel im2col: 9 statically shifted lane windows of the flat
        # padded input -> (KP, NL) VMEM slab.  Zero-init first so the
        # [Cin, cpt) padding rows are exactly 0 (their weights are 0, but
        # uninitialized VMEM could hold NaNs and 0*NaN = NaN).
        slab_ref[...] = jnp.zeros_like(slab_ref)
        for t in range(9):
            ky, kx = divmod(t, 3)
            off = ky * Wp + kx
            slab_ref[t * cpt:t * cpt + Cin, :] = (
                x_ref[:, off:off + NL].astype(jnp.float32))

        # Conv + bias: a single MXU push covering the whole batch.
        y = jnp.dot(w_ref[...].astype(jnp.float32), slab_ref[...],
                    preferred_element_type=jnp.float32) + b_ref[...]

        # One-pass BatchNorm batch statistics (masked, biased variance, f32).
        m = m_ref[...]
        ym = y * m
        s1 = jnp.sum(ym, axis=1, keepdims=True)
        s2 = jnp.sum(ym * y, axis=1, keepdims=True)
        mean = s1 * inv_cnt
        var = s2 * inv_cnt - mean * mean
        inv_std = jax.lax.rsqrt(var + BN_EPS)
        scale = g_ref[...] * inv_std
        shift = beta_ref[...] - mean * scale

        # Normalize + LeakyReLU; one lane-dense store.
        z = y * scale + shift
        out_ref[...] = jnp.where(z >= 0.0, z, LEAKY_SLOPE * z)

    out = pl.pallas_call(
        kernel,
        out_shape=jax.ShapeDtypeStruct((Cout, NL), jnp.float32),
        grid=(1,),
        in_specs=[
            pl.BlockSpec((Cin, Lx), lambda i: (0, 0)),
            pl.BlockSpec((Cout, KP), lambda i: (0, 0)),
            pl.BlockSpec((Cout, 1), lambda i: (0, 0)),
            pl.BlockSpec((Cout, 1), lambda i: (0, 0)),
            pl.BlockSpec((Cout, 1), lambda i: (0, 0)),
            pl.BlockSpec((1, NL), lambda i: (0, 0)),
        ],
        out_specs=pl.BlockSpec((Cout, NL), lambda i: (0, 0)),
        scratch_shapes=[pltpu.VMEM((KP, NL), jnp.float32)],
        compiler_params=pltpu.CompilerParams(
            dimension_semantics=("arbitrary",)),
    )(xflat, w2, b2, g2, be2, mask)

    # (Cout, N*L) -> NCHW: drop pad/wrap columns; cheap XLA slice + transpose.
    out = out.reshape(Cout, N, Hp, Wp)[:, :, :Hu, :Wu]
    return jnp.transpose(out, (1, 0, 2, 3))


# ---------------------------------------------------------------------------
# Pure-JAX reference (correctness check only).
# ---------------------------------------------------------------------------
def _reference(x, weight, bias, gamma, beta, stride):
    xu = jnp.repeat(jnp.repeat(x, stride, axis=2), stride, axis=3)
    y = jax.lax.conv_general_dilated(
        xu, weight, window_strides=(1, 1), padding=((1, 1), (1, 1)),
        dimension_numbers=("NCHW", "OIHW", "NCHW"),
        precision=jax.lax.Precision.HIGHEST)
    y = y + bias[None, :, None, None]
    mean = jnp.mean(y, axis=(0, 2, 3), keepdims=True)
    var = jnp.mean((y - mean) ** 2, axis=(0, 2, 3), keepdims=True)
    yn = (y - mean) / jnp.sqrt(var + BN_EPS)
    yn = yn * gamma[None, :, None, None] + beta[None, :, None, None]
    return jnp.where(yn >= 0, yn, LEAKY_SLOPE * yn)


if __name__ == "__main__":
    # ConvUpBNReLU(nin=4, nout=8, stride=2) on a (2, 4, 16, 16) NCHW input.
    N, Cin, H, W = 2, 4, 16, 16
    Cout, stride = 8, 2

    key = jax.random.PRNGKey(0)
    k1, k2, k3 = jax.random.split(key, 3)
    x = jax.random.normal(k1, (N, Cin, H, W), jnp.float32)
    weight = jax.random.normal(k2, (Cout, Cin, 3, 3), jnp.float32) * 0.1
    bias = jax.random.normal(k3, (Cout,), jnp.float32) * 0.1
    gamma = jnp.ones((Cout,), jnp.float32)   # BatchNorm2d default init
    beta = jnp.zeros((Cout,), jnp.float32)

    out = jax.block_until_ready(
        conv_up_bn_relu(x, weight, bias, gamma, beta, stride=stride))
    assert out.shape == (N, Cout, H * stride, W * stride), out.shape

    # Tight check: reference fed the same bf16-quantized activations/weights
    # the kernel feeds the MXU (both accumulate in f32).
    x_q = x.astype(jnp.bfloat16).astype(jnp.float32)
    w_q = weight.astype(jnp.bfloat16).astype(jnp.float32)
    ref_q = _reference(x_q, w_q, bias, gamma, beta, stride)
    assert jnp.allclose(out, ref_q, atol=2e-3, rtol=2e-3), \
        float(jnp.max(jnp.abs(out - ref_q)))
    # Loose sanity check vs. the pure-f32 reference (bf16 input quantization).
    ref_f = _reference(x, weight, bias, gamma, beta, stride)
    assert jnp.allclose(out, ref_f, atol=5e-2, rtol=5e-2), \
        float(jnp.max(jnp.abs(out - ref_f)))

    # Also exercise the stride=1 (no upsampling) path.
    out1 = jax.block_until_ready(
        conv_up_bn_relu(x, weight, bias, gamma, beta, stride=1))
    ref1 = _reference(x_q, w_q, bias, gamma, beta, 1)
    assert jnp.allclose(out1, ref1, atol=2e-3, rtol=2e-3), \
        float(jnp.max(jnp.abs(out1 - ref1)))

    print("KERNEL_OK")
</pallas_src>

<mosaic_0001>
module attributes {stable_mosaic.version = 11 : i64} {
  func.func @kernel(%arg0: i32, %arg1: memref<4x2432xbf16, #tpu.memory_space<vmem>>, %arg2: memref<8x72xbf16, #tpu.memory_space<vmem>>, %arg3: memref<8x1xf32, #tpu.memory_space<vmem>>, %arg4: memref<8x1xf32, #tpu.memory_space<vmem>>, %arg5: memref<8x1xf32, #tpu.memory_space<vmem>>, %arg6: memref<1x2312xf32, #tpu.memory_space<vmem>>, %arg7: memref<8x2312xf32, #tpu.memory_space<vmem>>, %arg8: memref<72x2312xf32, #tpu.memory_space<vmem>>) attributes {dimension_semantics = [#tpu.dimension_semantics<arbitrary>], iteration_bounds = array<i64: 1>, scalar_prefetch = 0 : i64, scratch_operands = 1 : i64, tpu.core_type = #tpu.core_type<tc>, window_params = [{pipeline_mode = #tpu.pipeline_mode<synchronous>, transform_indices = @transform_0, window_bounds = array<i64: 4, 2432>}, {pipeline_mode = #tpu.pipeline_mode<synchronous>, transform_indices = @transform_1, window_bounds = array<i64: 8, 72>}, {pipeline_mode = #tpu.pipeline_mode<synchronous>, transform_indices = @transform_2, window_bounds = array<i64: 8, 1>}, {pipeline_mode = #tpu.pipeline_mode<synchronous>, transform_indices = @transform_3, window_bounds = array<i64: 8, 1>}, {pipeline_mode = #tpu.pipeline_mode<synchronous>, transform_indices = @transform_4, window_bounds = array<i64: 8, 1>}, {pipeline_mode = #tpu.pipeline_mode<synchronous>, transform_indices = @transform_5, window_bounds = array<i64: 1, 2312>}, {pipeline_mode = #tpu.pipeline_mode<synchronous>, transform_indices = @transform_6, window_bounds = array<i64: 8, 2312>}]} {
    %cst = arith.constant 0.000000e+00 : f32
    %0 = vector.broadcast %cst : f32 to vector<72x2312xf32>
    %c0 = arith.constant 0 : index
    %c0_0 = arith.constant 0 : index
    %1 = vector.load %arg8[%c0, %c0_0] : memref<72x2312xf32, #tpu.memory_space<vmem>>, vector<72x2312xf32>
    tpu.vector_store %arg8[%c0, %c0_0], %0 {strides = array<i32>} : memref<72x2312xf32, #tpu.memory_space<vmem>>, vector<72x2312xf32>,
    %c0_1 = arith.constant 0 : index
    %c0_2 = arith.constant 0 : index
    %2 = vector.load %arg1[%c0_1, %c0_2] : memref<4x2432xbf16, #tpu.memory_space<vmem>>, vector<4x2312xbf16>
    %3 = arith.extf %2 : vector<4x2312xbf16> to vector<4x2312xf32>
    %c0_3 = arith.constant 0 : index
    %c0_4 = arith.constant 0 : index
    %4 = vector.load %arg8[%c0_3, %c0_4] : memref<72x2312xf32, #tpu.memory_space<vmem>>, vector<4x2312xf32>
    tpu.vector_store %arg8[%c0_3, %c0_4], %3 {strides = array<i32>} : memref<72x2312xf32, #tpu.memory_space<vmem>>, vector<4x2312xf32>,
    %c0_5 = arith.constant 0 : index
    %c1 = arith.constant 1 : index
    %5 = vector.load %arg1[%c0_5, %c1] : memref<4x2432xbf16, #tpu.memory_space<vmem>>, vector<4x2312xbf16>
    %6 = arith.extf %5 : vector<4x2312xbf16> to vector<4x2312xf32>
    %c8 = arith.constant 8 : index
    %c0_6 = arith.constant 0 : index
    %7 = vector.load %arg8[%c8, %c0_6] : memref<72x2312xf32, #tpu.memory_space<vmem>>, vector<4x2312xf32>
    tpu.vector_store %arg8[%c8, %c0_6], %6 {strides = array<i32>} : memref<72x2312xf32, #tpu.memory_space<vmem>>, vector<4x2312xf32>,
    %c0_7 = arith.constant 0 : index
    %c2 = arith.constant 2 : index
    %8 = vector.load %arg1[%c0_7, %c2] : memref<4x2432xbf16, #tpu.memory_space<vmem>>, vector<4x2312xbf16>
    %9 = arith.extf %8 : vector<4x2312xbf16> to vector<4x2312xf32>
    %c16 = arith.constant 16 : index
    %c0_8 = arith.constant 0 : index
    %10 = vector.load %arg8[%c16, %c0_8] : memref<72x2312xf32, #tpu.memory_space<vmem>>, vector<4x2312xf32>
    tpu.vector_store %arg8[%c16, %c0_8], %9 {strides = array<i32>} : memref<72x2312xf32, #tpu.memory_space<vmem>>, vector<4x2312xf32>,
    %c0_9 = arith.constant 0 : index
    %c34 = arith.constant 34 : index
    %11 = vector.load %arg1[%c0_9, %c34] : memref<4x2432xbf16, #tpu.memory_space<vmem>>, vector<4x2312xbf16>
    %12 = arith.extf %11 : vector<4x2312xbf16> to vector<4x2312xf32>
    %c24 = arith.constant 24 : index
    %c0_10 = arith.constant 0 : index
    %13 = vector.load %arg8[%c24, %c0_10] : memref<72x2312xf32, #tpu.memory_space<vmem>>, vector<4x2312xf32>
    tpu.vector_store %arg8[%c24, %c0_10], %12 {strides = array<i32>} : memref<72x2312xf32, #tpu.memory_space<vmem>>, vector<4x2312xf32>,
    %c0_11 = arith.constant 0 : index
    %c35 = arith.constant 35 : index
    %14 = vector.load %arg1[%c0_11, %c35] : memref<4x2432xbf16, #tpu.memory_space<vmem>>, vector<4x2312xbf16>
    %15 = arith.extf %14 : vector<4x2312xbf16> to vector<4x2312xf32>
    %c32 = arith.constant 32 : index
    %c0_12 = arith.constant 0 : index
    %16 = vector.load %arg8[%c32, %c0_12] : memref<72x2312xf32, #tpu.memory_space<vmem>>, vector<4x2312xf32>
    tpu.vector_store %arg8[%c32, %c0_12], %15 {strides = array<i32>} : memref<72x2312xf32, #tpu.memory_space<vmem>>, vector<4x2312xf32>,
    %c0_13 = arith.constant 0 : index
    %c36 = arith.constant 36 : index
    %17 = vector.load %arg1[%c0_13, %c36] : memref<4x2432xbf16, #tpu.memory_space<vmem>>, vector<4x2312xbf16>
    %18 = arith.extf %17 : vector<4x2312xbf16> to vector<4x2312xf32>
    %c40 = arith.constant 40 : index
    %c0_14 = arith.constant 0 : index
    %19 = vector.load %arg8[%c40, %c0_14] : memref<72x2312xf32, #tpu.memory_space<vmem>>, vector<4x2312xf32>
    tpu.vector_store %arg8[%c40, %c0_14], %18 {strides = array<i32>} : memref<72x2312xf32, #tpu.memory_space<vmem>>, vector<4x2312xf32>,
    %c0_15 = arith.constant 0 : index
    %c68 = arith.constant 68 : index
    %20 = vector.load %arg1[%c0_15, %c68] : memref<4x2432xbf16, #tpu.memory_space<vmem>>, vector<4x2312xbf16>
    %21 = arith.extf %20 : vector<4x2312xbf16> to vector<4x2312xf32>
    %c48 = arith.constant 48 : index
    %c0_16 = arith.constant 0 : index
    %22 = vector.load %arg8[%c48, %c0_16] : memref<72x2312xf32, #tpu.memory_space<vmem>>, vector<4x2312xf32>
    tpu.vector_store %arg8[%c48, %c0_16], %21 {strides = array<i32>} : memref<72x2312xf32, #tpu.memory_space<vmem>>, vector<4x2312xf32>,
    %c0_17 = arith.constant 0 : index
    %c69 = arith.constant 69 : index
    %23 = vector.load %arg1[%c0_17, %c69] : memref<4x2432xbf16, #tpu.memory_space<vmem>>, vector<4x2312xbf16>
    %24 = arith.extf %23 : vector<4x2312xbf16> to vector<4x2312xf32>
    %c56 = arith.constant 56 : index
    %c0_18 = arith.constant 0 : index
    %25 = vector.load %arg8[%c56, %c0_18] : memref<72x2312xf32, #tpu.memory_space<vmem>>, vector<4x2312xf32>
    tpu.vector_store %arg8[%c56, %c0_18], %24 {strides = array<i32>} : memref<72x2312xf32, #tpu.memory_space<vmem>>, vector<4x2312xf32>,
    %c0_19 = arith.constant 0 : index
    %c70 = arith.constant 70 : index
    %26 = vector.load %arg1[%c0_19, %c70] : memref<4x2432xbf16, #tpu.memory_space<vmem>>, vector<4x2312xbf16>
    %27 = arith.extf %26 : vector<4x2312xbf16> to vector<4x2312xf32>
    %c64 = arith.constant 64 : index
    %c0_20 = arith.constant 0 : index
    %28 = vector.load %arg8[%c64, %c0_20] : memref<72x2312xf32, #tpu.memory_space<vmem>>, vector<4x2312xf32>
    tpu.vector_store %arg8[%c64, %c0_20], %27 {strides = array<i32>} : memref<72x2312xf32, #tpu.memory_space<vmem>>, vector<4x2312xf32>,
    %c0_21 = arith.constant 0 : index
    %c0_22 = arith.constant 0 : index
    %29 = vector.load %arg2[%c0_21, %c0_22] : memref<8x72xbf16, #tpu.memory_space<vmem>>, vector<8x72xbf16>
    %30 = arith.extf %29 : vector<8x72xbf16> to vector<8x72xf32>
    %c0_23 = arith.constant 0 : index
    %c0_24 = arith.constant 0 : index
    %31 = vector.load %arg8[%c0_23, %c0_24] : memref<72x2312xf32, #tpu.memory_space<vmem>>, vector<72x2312xf32>
    %cst_25 = arith.constant dense<0.000000e+00> : vector<8x2312xf32>
    %32 = tpu.matmul %30, %31, %cst_25 {dimension_numbers = #tpu.dot_dimension_numbers<[1], [0], [0], [1], [0, 0, 1, 1], [], []>} : vector<8x72xf32>, vector<72x2312xf32>, vector<8x2312xf32> -> vector<8x2312xf32>
    %c0_26 = arith.constant 0 : index
    %c0_27 = arith.constant 0 : index
    %33 = vector.load %arg3[%c0_26, %c0_27] : memref<8x1xf32, #tpu.memory_space<vmem>>, vector<8x1xf32>
    %34 = vector.broadcast %33 : vector<8x1xf32> to vector<8x2312xf32>
    %35 = arith.addf %32, %34 : vector<8x2312xf32>
    %c0_28 = arith.constant 0 : index
    %c0_29 = arith.constant 0 : index
    %36 = vector.load %arg6[%c0_28, %c0_29] : memref<1x2312xf32, #tpu.memory_space<vmem>>, vector<1x2312xf32>
    %37 = vector.broadcast %36 : vector<1x2312xf32> to vector<8x2312xf32>
    %38 = arith.mulf %35, %37 : vector<8x2312xf32>
    %cst_30 = arith.constant dense<0.000000e+00> : vector<8xf32>
    %39 = vector.multi_reduction <add>, %38, %cst_30 [1] : vector<8x2312xf32> to vector<8xf32>
    %40 = vector.shape_cast %39 : vector<8xf32> to vector<8x1xf32>
    %41 = arith.mulf %38, %35 : vector<8x2312xf32>
    %cst_31 = arith.constant dense<0.000000e+00> : vector<8xf32>
    %42 = vector.multi_reduction <add>, %41, %cst_31 [1] : vector<8x2312xf32> to vector<8xf32>
    %43 = vector.shape_cast %42 : vector<8xf32> to vector<8x1xf32>
    %cst_32 = arith.constant 4.8828125E-4 : f32
    %44 = vector.broadcast %cst_32 : f32 to vector<8x1xf32>
    %45 = arith.mulf %40, %44 : vector<8x1xf32>
    %cst_33 = arith.constant 4.8828125E-4 : f32
    %46 = vector.broadcast %cst_33 : f32 to vector<8x1xf32>
    %47 = arith.mulf %43, %46 : vector<8x1xf32>
    %48 = arith.mulf %45, %45 : vector<8x1xf32>
    %49 = arith.subf %47, %48 : vector<8x1xf32>
    %cst_34 = arith.constant 9.99999974E-6 : f32
    %50 = vector.broadcast %cst_34 : f32 to vector<8x1xf32>
    %51 = arith.addf %49, %50 : vector<8x1xf32>
    %52 = math.rsqrt %51 : vector<8x1xf32>
    %c0_35 = arith.constant 0 : index
    %c0_36 = arith.constant 0 : index
    %53 = vector.load %arg4[%c0_35, %c0_36] : memref<8x1xf32, #tpu.memory_space<vmem>>, vector<8x1xf32>
    %54 = arith.mulf %53, %52 : vector<8x1xf32>
    %c0_37 = arith.constant 0 : index
    %c0_38 = arith.constant 0 : index
    %55 = vector.load %arg5[%c0_37, %c0_38] : memref<8x1xf32, #tpu.memory_space<vmem>>, vector<8x1xf32>
    %56 = arith.mulf %45, %54 : vector<8x1xf32>
    %57 = arith.subf %55, %56 : vector<8x1xf32>
    %58 = vector.broadcast %54 : vector<8x1xf32> to vector<8x2312xf32>
    %59 = arith.mulf %35, %58 : vector<8x2312xf32>
    %60 = vector.broadcast %57 : vector<8x1xf32> to vector<8x2312xf32>
    %61 = arith.addf %59, %60 : vector<8x2312xf32>
    %cst_39 = arith.constant 0.000000e+00 : f32
    %62 = vector.broadcast %cst_39 : f32 to vector<8x2312xf32>
    %63 = arith.cmpf oge, %61, %62 : vector<8x2312xf32>
    %cst_40 = arith.constant 0.00999999977 : f32
    %64 = vector.broadcast %cst_40 : f32 to vector<8x2312xf32>
    %65 = arith.mulf %64, %61 : vector<8x2312xf32>
    %66 = arith.select %63, %61, %65 : vector<8x2312xi1>, vector<8x2312xf32>
    %c0_41 = arith.constant 0 : index
    %c0_42 = arith.constant 0 : index
    %67 = vector.load %arg7[%c0_41, %c0_42] : memref<8x2312xf32, #tpu.memory_space<vmem>>, vector<8x2312xf32>
    tpu.vector_store %arg7[%c0_41, %c0_42], %66 {strides = array<i32>} : memref<8x2312xf32, #tpu.memory_space<vmem>>, vector<8x2312xf32>,
    return
  }
  func.func @transform_0(%arg0: i32) -> (i32, i32) {
    %c0_i32 = arith.constant 0 : i32
    %c0_i32_0 = arith.constant 0 : i32
    %c0_i32_1 = arith.constant 0 : i32
    return %c0_i32, %c0_i32_0 : i32, i32
  }
  func.func @transform_1(%arg0: i32) -> (i32, i32) {
    %c0_i32 = arith.constant 0 : i32
    %c0_i32_0 = arith.constant 0 : i32
    %c0_i32_1 = arith.constant 0 : i32
    return %c0_i32, %c0_i32_0 : i32, i32
  }
  func.func @transform_2(%arg0: i32) -> (i32, i32) {
    %c0_i32 = arith.constant 0 : i32
    %c0_i32_0 = arith.constant 0 : i32
    %c0_i32_1 = arith.constant 0 : i32
    return %c0_i32, %c0_i32_0 : i32, i32
  }
  func.func @transform_3(%arg0: i32) -> (i32, i32) {
    %c0_i32 = arith.constant 0 : i32
    %c0_i32_0 = arith.constant 0 : i32
    %c0_i32_1 = arith.constant 0 : i32
    return %c0_i32, %c0_i32_0 : i32, i32
  }
  func.func @transform_4(%arg0: i32) -> (i32, i32) {
    %c0_i32 = arith.constant 0 : i32
    %c0_i32_0 = arith.constant 0 : i32
    %c0_i32_1 = arith.constant 0 : i32
    return %c0_i32, %c0_i32_0 : i32, i32
  }
  func.func @transform_5(%arg0: i32) -> (i32, i32) {
    %c0_i32 = arith.constant 0 : i32
    %c0_i32_0 = arith.constant 0 : i32
    %c0_i32_1 = arith.constant 0 : i32
    return %c0_i32, %c0_i32_0 : i32, i32
  }
  func.func @transform_6(%arg0: i32) -> (i32, i32) {
    %c0_i32 = arith.constant 0 : i32
    %c0_i32_0 = arith.constant 0 : i32
    %c0_i32_1 = arith.constant 0 : i32
    return %c0_i32, %c0_i32_0 : i32, i32
  }
}

</mosaic_0001>

<bundles_post_ra>
// kernel: tpu_custom_call.1
= control target key start
LH: loop header
LB: loop body
LE: loop exit
PB: predicated region body
PF: predicated region fallthrough
CT: control target
= control target key end

     0   :  { %11 = vsyncpa [#allocation4], 0  ;;  %s4249_s0 = inlined_call_operand.hbm [shape: bf16[4,2432], index: 0, kind: input, shape index: {}]   ;;  %s4250_s1 = inlined_call_operand.vmem [shape: bf16[8,72], index: 1, kind: input, shape index: {}]   ;;  %s4251_s2 = inlined_call_operand.vmem [shape: f32[8,1], index: 2, kind: input, shape index: {}]   ;;  %s4252_s3 = inlined_call_operand.vmem [shape: f32[8,1], index: 3, kind: input, shape index: {}]   ;;  %s4253_s4 = inlined_call_operand.vmem [shape: f32[8,1], index: 4, kind: input, shape index: {}]   ;;  %s4254_s5 = inlined_call_operand.vmem [shape: f32[1,2312], index: 5, kind: input, shape index: {}]   ;;  %s4255_s6 = inlined_call_operand.hbm [shape: f32[8,2312], index: 6, kind: output, shape index: {}]  }
   0x1   :  { %12 = vsyncpa [#allocation5], 0  ;;  %s3150_s21 = smov [#allocation3]   ;;  %s3102_s25 = scalar_lea.hbm %s4249_s0, 608 }
   0x2   :  { %s19_s22 = sshll.u32 %s3150_s21, 4  ;;  %p3103_p0 = scmp.ne.s32.totalorder %s4249_s0, %s3102_s25  ;;  %s20_s22 = int_to_ptr.vmem [resolvable:$true] %s19_s22 }
   0x3   :  { %p3106_p1 = scmp.lt.u32.totalorder %s3102_s25, %s4249_s0 }
   0x5   :  { %p3108_p2 = pnand %p3106_p1, %p3103_p0 }
   0x7   :  { %3111 = shalt.err (!%p3108_p2)
}
   0x8   :  { %s3112_s30 = scalar_lea.vmem %s20_s22, 608  ;;  %p3117_p4 = scmp.lt.s32.totalorder %s20_s22, %s20_s22 }
   0x9   :  { %p3113_p3 = scmp.ne.s32.totalorder %s20_s22, %s3112_s30  ;;  %p3118_p5 = scmp.lt.s32.totalorder %s3112_s30, %s3112_s30 }
   0xb   :  { %p3119_p6 = por %p3118_p5, %p3117_p4 }
   0xd   :  { %p3120_p7 = pnand %p3119_p6, %p3113_p3 }
   0xf   :  { %3123 = shalt.err (!%p3120_p7)
}
  0x10   :  { %22 = dma.hbm_to_vmem [thread:$0]  %s4249_s0, 608, %s20_s22, [#allocation4]  }
  0x11   :  { %3146 = dma.done.wait [#allocation4], 608  }
  0x12   :  { %3147 = vsyncadd [#allocation4], 4294966688  ;;  %v3151_v0 = vmov 0.0   ;;  %v271_v1 = vld [vmem:[#allocation3 + $0x8] sm:$0xff]  ;;  %v270_v2 = vld [vmem:[#allocation3] sm:$0xff]  ;;  %s3152_s0 = smov 127  }
  0x13   :  { %60 = vst [vmem:[#allocation2 + $0xb8] sm:$0xff] %v3151_v0  ;;  %36 = vst [vmem:[#allocation2] sm:$0xff] %v3151_v0  ;;  %1549 = vmatprep.mubr.f32.mxu0 %v3151_v0  ;;  %1620 = vmatprep.mubr.f32.mxu1 %v3151_v0  ;;  %v277_v3 = vunpack.c.l.bf16 %v271_v1  ;;  %v275_v4 = vunpack.c.l.bf16 %v270_v2  ;;  %v276_v5 = vunpack.c.h.bf16 %v270_v2  ;;  %v209_v11 = vld [vmem:[#allocation3 + $0x8] sm:$0xff]  ;;  %s3153_s9 = smov 126   ;;  %s3154_s10 = smov 94   ;;  %v278_v14 = vunpack.c.h.bf16 %v271_v1  ;;  %v272_v17 = vld [vmem:[#allocation3 + $0x10] sm:$0xff] }
  0x14   :  { %37 = vst [vmem:[#allocation2 + $0x8] sm:$0xff] %v3151_v0  ;;  %38 = vst [vmem:[#allocation2 + $0x10] sm:$0xff] %v3151_v0  ;;  %v215_v13 = vunpack.c.l.bf16 %v209_v11  ;;  %s3155_s11 = smov 93   ;;  %s3156_s12 = smov 92   ;;  %v216_v18 = vunpack.c.h.bf16 %v209_v11  ;;  %v279_v20 = vunpack.c.l.bf16 %v272_v17  ;;  %v210_v22 = vld [vmem:[#allocation3 + $0x10] sm:$0xff]  ;;  %v280_v26 = vunpack.c.h.bf16 %v272_v17  ;;  %v273_v27 = vld [vmem:[#allocation3 + $0x18] sm:$0xff] }
  0x15   :  { %39 = vst [vmem:[#allocation2 + $0x18] sm:$0xff] %v3151_v0  ;;  %40 = vst [vmem:[#allocation2 + $0x20] sm:$0xff] %v3151_v0  ;;  %v297_v6 = vcombine.high %v277_v3, %v277_v3  ;;  %v295_v7 = vcombine.high %v275_v4, %v275_v4  ;;  %v296_v8 = vcombine.high %v276_v5, %v276_v5  ;;  %s3157_s13 = smov 60   ;;  %s3158_s14 = smov 59   ;;  %v217_v23 = vunpack.c.l.bf16 %v210_v22  ;;  %v211_v32 = vld [vmem:[#allocation3 + $0x18] sm:$0xff] }
  0x16   :  { %41 = vst [vmem:[#allocation2 + $0x28] sm:$0xff] %v3151_v0  ;;  %42 = vst [vmem:[#allocation2 + $0x30] sm:$0xff] %v3151_v0  ;;  %v234_v15 = vcombine.high %v215_v13, %v215_v13  ;;  %v298_v16 = vcombine.high %v278_v14, %v278_v14  ;;  %v235_v21 = vcombine.high %v216_v18, %v216_v18  ;;  %s3159_s15 = smov 58   ;;  %v218_v29 = vunpack.c.h.bf16 %v210_v22  ;;  %v3425_v39 = vld [vmem:[#allocation3 + $0x20] sm:$0x3f] }
  0x17   :  { %43 = vst [vmem:[#allocation2 + $0x38] sm:$0xff] %v3151_v0  ;;  %44 = vst [vmem:[#allocation2 + $0x40] sm:$0xff] %v3151_v0  ;;  %v2746_v9 = vpack.i.bf16 %v297_v6, %v277_v3  ;;  %v2736_v10 = vpack.i.bf16 %v276_v5, %v295_v7  ;;  %v2741_v12 = vpack.i.bf16 %v296_v8, %v275_v4  ;;  %v281_v31 = vunpack.c.l.bf16 %v273_v27  ;;  %v3430_v44 = vld [vmem:[#allocation3 + $0x20] sm:$0x3f] }
  0x18   :  { %45 = vst [vmem:[#allocation2 + $0x48] sm:$0xff] %v3151_v0  ;;  %46 = vst [vmem:[#allocation2 + $0x50] sm:$0xff] %v3151_v0  ;;  %v2841_v19 = vpack.i.bf16 %v298_v16, %v278_v14  ;;  %v299_v24 = vcombine.high %v279_v20, %v279_v20  ;;  %v236_v28 = vcombine.high %v217_v23, %v217_v23  ;;  %v219_v34 = vunpack.c.l.bf16 %v211_v32  ;;  %v3440_v49 = vld [vmem:[#allocation3 + $0x20] sm:$0x3f] }
  0x19   :  { %47 = vst [vmem:[#allocation2 + $0x58] sm:$0xff] %v3151_v0  ;;  %48 = vst [vmem:[#allocation2 + $0x60] sm:$0xff] %v3151_v0  ;;  %2747 = vrot.lane.b32.xlu1 %v2746_v9, %s3152_s0  ;;  %2737 = vrot.lane.b32.xlu0 %v2736_v10, %s3152_s0  ;;  %v300_v30 = vcombine.high %v280_v26, %v280_v26  ;;  %v237_v33 = vcombine.high %v218_v29, %v218_v29  ;;  %v282_v38 = vunpack.c.h.bf16 %v273_v27  ;;  %v3448_v53 = vld [vmem:[#allocation3 + $0x20] sm:$0x3f]  ;;  %vm342_vm0 = vcmask 1039360  }
  0x1a   :  { %49 = vst [vmem:[#allocation2 + $0x68] sm:$0xff] %v3151_v0  ;;  %50 = vst [vmem:[#allocation2 + $0x70] sm:$0xff] %v3151_v0  ;;  %v2856_v25 = vpack.i.bf16 %v299_v24, %v279_v20  ;;  %v301_v36 = vcombine.high %v281_v31, %v281_v31  ;;  %v238_v40 = vcombine.high %v219_v34, %v219_v34  ;;  %v220_v41 = vunpack.c.h.bf16 %v211_v32  ;;  %v3472_v11 = vld [vmem:[#allocation3 + $0x20] sm:$0x3f] }
  0x1b   :  { %51 = vst [vmem:[#allocation2 + $0x78] sm:$0xff] %v3151_v0  ;;  %52 = vst [vmem:[#allocation2 + $0x80] sm:$0xff] %v3151_v0  ;;  %v2926_v35 = vpack.i.bf16 %v300_v30, %v280_v26  ;;  %v302_v42 = vcombine.high %v282_v38, %v282_v38  ;;  %v283_v43 = vunpack.c.l.bf16 %v3425_v39  ;;  %v3433_v46 = vunpack.c.l.bf16 %v3430_v44 }
  0x1c   :  { %53 = vst [vmem:[#allocation2 + $0x88] sm:$0xff] %v3151_v0  ;;  %56 = vst [vmem:[#allocation2 + $0x98] sm:$0xff] %v3151_v0  ;;  %v2936_v37 = vpack.i.bf16 %v301_v36, %v281_v31  ;;  %v239_v45 = vcombine.high %v220_v41, %v220_v41  ;;  %v412_v51 = vunpack.c.l.bf16 %v3440_v49  ;;  %v3459_v60 = vunpack.c.l.bf16 %v3448_v53  ;;  %v3497_v36 = vld [vmem:[#allocation3 + $0x20] sm:$0x3f] }
  0x1d   :  { %57 = vst [vmem:[#allocation2 + $0xa0] sm:$0xff] %v3151_v0  ;;  %58 = vst [vmem:[#allocation2 + $0xa8] sm:$0xff] %v3151_v0  ;;  %2752 = vrot.lane.b32.xlu1 %v2736_v10, %s3153_s9  ;;  %2742 = vrot.lane.b32.xlu0 %v2741_v12, %s3152_s0  ;;  %v3437_v47 = vpack.i.bf16 %v302_v42, %v282_v38  ;;  %v303_v48 = vcombine.high %v283_v43, %v283_v43  ;;  %vm471_vm1 = vcmask 1031168   ;;  %vm600_vm2 = vcmask 769024  }
  0x1e   :  { %59 = vst [vmem:[#allocation2 + $0xb0] sm:$0xff] %v3151_v0  ;;  %61 = vst [vmem:[#allocation2 + $0xc0] sm:$0xff] %v3151_v0  ;;  %v432_v52 = vcombine.high %v412_v51, %v412_v51  ;;  %v3481_v20 = vunpack.c.l.bf16 %v3472_v11  ;;  %vm4256_vm3 = vcmask 64512   ;;  %vm268_vm4 = vcmask 60416  }
  0x1f   :  { %62 = vst [vmem:[#allocation2 + $0xc8] sm:$0xff] %v3151_v0  ;;  %63 = vst [vmem:[#allocation2 + $0xd0] sm:$0xff] %v3151_v0  ;;  %v3016_v50 = vpack.i.bf16 %v303_v48, %v283_v43  ;;  %v222_v38 = vunpack.c.h.bf16 %v3430_v44  ;;  %vm729_vm5 = vcmask 760832   ;;  %vm858_vm6 = vcmask 752640  }
  0x20   :  { %64 = vst [vmem:[#allocation2 + $0xd8] sm:$0xff] %v3151_v0  ;;  %65 = vst [vmem:[#allocation2 + $0xe0] sm:$0xff] %v3151_v0  ;;  %v3036_v61 = vpack.i.bf16 %v432_v52, %v412_v51  ;;  %vm987_vm7 = vcmask 490496   ;;  %vm1116_vm8 = vcmask 482304   ;;  %vm1245_vm9 = vcmask 474112  }
  0x21   :  { %66 = vst [vmem:[#allocation2 + $0xe8] sm:$0xff] %v3151_v0  ;;  %67 = vst [vmem:[#allocation2 + $0xf0] sm:$0xff] %v3151_v0  ;;  %2762 = vrot.lane.b32.xlu1 %v2741_v12, %s3153_s9  ;;  %2757 = vrot.lane.b32.xlu0 %v2736_v10, %s3154_s10  ;;  %vm1481_vm10 = vcmask 588800   ;;  %vm3162_vm11 = vmmov 0  }
  0x22   :  { %68 = vst [vmem:[#allocation2 + $0xf8] sm:$0xff] %v3151_v0  ;;  %69 = vst [vmem:[#allocation2 + $0x100] sm:$0xff] %v3151_v0 }
  0x23   :  { %70 = vst [vmem:[#allocation2 + $0x108] sm:$0xff] %v3151_v0  ;;  %71 = vst [vmem:[#allocation2 + $0x110] sm:$0xff] %v3151_v0 }
  0x24   :  { %72 = vst [vmem:[#allocation2 + $0x118] sm:$0xff] %v3151_v0  ;;  %73 = vst [vmem:[#allocation2 + $0x120] sm:$0xff] %v3151_v0 }
  0x25   :  { %75 = vst [vmem:[#allocation2 + $0x130] sm:$0xff] %v3151_v0  ;;  %76 = vst [vmem:[#allocation2 + $0x138] sm:$0xff] %v3151_v0  ;;  %2772 = vrot.lane.b32.xlu1 %v2746_v9, %s3153_s9  ;;  %2767 = vrot.lane.b32.xlu0 %v2741_v12, %s3154_s10 }
  0x26   :  { %77 = vst [vmem:[#allocation2 + $0x140] sm:$0xff] %v3151_v0  ;;  %78 = vst [vmem:[#allocation2 + $0x148] sm:$0xff] %v3151_v0 }
  0x27   :  { %79 = vst [vmem:[#allocation2 + $0x150] sm:$0xff] %v3151_v0  ;;  %80 = vst [vmem:[#allocation2 + $0x158] sm:$0xff] %v3151_v0 }
  0x28   :  { %81 = vst [vmem:[#allocation2 + $0x160] sm:$0xff] %v3151_v0  ;;  %82 = vst [vmem:[#allocation2 + $0x168] sm:$0xff] %v3151_v0 }
  0x29   :  { %83 = vst [vmem:[#allocation2 + $0x170] sm:$0xff] %v3151_v0  ;;  %84 = vst [vmem:[#allocation2 + $0x178] sm:$0xff] %v3151_v0  ;;  %2782 = vrot.lane.b32.xlu1 %v2736_v10, %s3155_s11  ;;  %2777 = vrot.lane.b32.xlu0 %v2746_v9, %s3154_s10 }
  0x2a   :  { %85 = vst [vmem:[#allocation2 + $0x180] sm:$0xff] %v3151_v0  ;;  %86 = vst [vmem:[#allocation2 + $0x188] sm:$0xff] %v3151_v0 }
  0x2b   :  { %87 = vst [vmem:[#allocation2 + $0x190] sm:$0xff] %v3151_v0  ;;  %88 = vst [vmem:[#allocation2 + $0x198] sm:$0xff] %v3151_v0 }
  0x2c   :  { %89 = vst [vmem:[#allocation2 + $0x1a0] sm:$0xff] %v3151_v0  ;;  %90 = vst [vmem:[#allocation2 + $0x1a8] sm:$0xff] %v3151_v0 }
  0x2d   :  { %91 = vst [vmem:[#allocation2 + $0x1b0] sm:$0xff] %v3151_v0  ;;  %92 = vst [vmem:[#allocation2 + $0x1b8] sm:$0xff] %v3151_v0  ;;  %2792 = vrot.lane.b32.xlu1 %v2741_v12, %s3155_s11  ;;  %2787 = vrot.lane.b32.xlu0 %v2736_v10, %s3156_s12 }
  0x2e   :  { %94 = vst [vmem:[#allocation2 + $0x1c8] sm:$0xff] %v3151_v0  ;;  %95 = vst [vmem:[#allocation2 + $0x1d0] sm:$0xff] %v3151_v0 }
  0x2f   :  { %96 = vst [vmem:[#allocation2 + $0x1d8] sm:$0xff] %v3151_v0  ;;  %97 = vst [vmem:[#allocation2 + $0x1e0] sm:$0xff] %v3151_v0 }
  0x30   :  { %98 = vst [vmem:[#allocation2 + $0x1e8] sm:$0xff] %v3151_v0  ;;  %99 = vst [vmem:[#allocation2 + $0x1f0] sm:$0xff] %v3151_v0 }
  0x31   :  { %100 = vst [vmem:[#allocation2 + $0x1f8] sm:$0xff] %v3151_v0  ;;  %101 = vst [vmem:[#allocation2 + $0x200] sm:$0xff] %v3151_v0  ;;  %2802 = vrot.lane.b32.xlu1 %v2746_v9, %s3155_s11  ;;  %2797 = vrot.lane.b32.xlu0 %v2741_v12, %s3156_s12 }
  0x32   :  { %102 = vst [vmem:[#allocation2 + $0x208] sm:$0xff] %v3151_v0  ;;  %103 = vst [vmem:[#allocation2 + $0x210] sm:$0xff] %v3151_v0 }
  0x33   :  { %104 = vst [vmem:[#allocation2 + $0x218] sm:$0xff] %v3151_v0  ;;  %105 = vst [vmem:[#allocation2 + $0x220] sm:$0xff] %v3151_v0 }
  0x34   :  { %106 = vst [vmem:[#allocation2 + $0x228] sm:$0xff] %v3151_v0  ;;  %107 = vst [vmem:[#allocation2 + $0x230] sm:$0xff] %v3151_v0 }
  0x35   :  { %108 = vst [vmem:[#allocation2 + $0x238] sm:$0xff] %v3151_v0  ;;  %109 = vst [vmem:[#allocation2 + $0x240] sm:$0xff] %v3151_v0  ;;  %2812 = vrot.lane.b32.xlu1 %v2736_v10, %s3157_s13  ;;  %2807 = vrot.lane.b32.xlu0 %v2746_v9, %s3156_s12 }
  0x36   :  { %110 = vst [vmem:[#allocation2 + $0x248] sm:$0xff] %v3151_v0  ;;  %111 = vst [vmem:[#allocation2 + $0x250] sm:$0xff] %v3151_v0 }
  0x37   :  { %113 = vst [vmem:[#allocation2 + $0x260] sm:$0xff] %v3151_v0  ;;  %114 = vst [vmem:[#allocation2 + $0x268] sm:$0xff] %v3151_v0 }
  0x38   :  { %115 = vst [vmem:[#allocation2 + $0x270] sm:$0xff] %v3151_v0  ;;  %116 = vst [vmem:[#allocation2 + $0x278] sm:$0xff] %v3151_v0 }
  0x39   :  { %117 = vst [vmem:[#allocation2 + $0x280] sm:$0xff] %v3151_v0  ;;  %118 = vst [vmem:[#allocation2 + $0x288] sm:$0xff] %v3151_v0  ;;  %2822 = vrot.lane.b32.xlu1 %v2741_v12, %s3157_s13  ;;  %2817 = vrot.lane.b32.xlu0 %v2736_v10, %s3158_s14 }
  0x3a   :  { %119 = vst [vmem:[#allocation2 + $0x290] sm:$0xff] %v3151_v0  ;;  %120 = vst [vmem:[#allocation2 + $0x298] sm:$0xff] %v3151_v0 }
  0x3b   :  { %121 = vst [vmem:[#allocation2 + $0x2a0] sm:$0xff] %v3151_v0  ;;  %122 = vst [vmem:[#allocation2 + $0x2a8] sm:$0xff] %v3151_v0 }
  0x3c   :  { %123 = vst [vmem:[#allocation2 + $0x2b0] sm:$0xff] %v3151_v0  ;;  %124 = vst [vmem:[#allocation2 + $0x2b8] sm:$0xff] %v3151_v0 }
  0x3d   :  { %125 = vst [vmem:[#allocation2 + $0x2c0] sm:$0xff] %v3151_v0  ;;  %126 = vst [vmem:[#allocation2 + $0x2c8] sm:$0xff] %v3151_v0  ;;  %2832 = vrot.lane.b32.xlu1 %v2746_v9, %s3157_s13  ;;  %2827 = vrot.lane.b32.xlu0 %v2741_v12, %s3158_s14 }
  0x3e   :  { %127 = vst [vmem:[#allocation2 + $0x2d0] sm:$0xff] %v3151_v0  ;;  %128 = vst [vmem:[#allocation2 + $0x2d8] sm:$0xff] %v3151_v0 }
  0x3f   :  { %129 = vst [vmem:[#allocation2 + $0x2e0] sm:$0xff] %v3151_v0  ;;  %130 = vst [vmem:[#allocation2 + $0x2e8] sm:$0xff] %v3151_v0 }
  0x40   :  { %132 = vst [vmem:[#allocation2 + $0x2f8] sm:$0xff] %v3151_v0  ;;  %133 = vst [vmem:[#allocation2 + $0x300] sm:$0xff] %v3151_v0 }
  0x41   :  { %134 = vst [vmem:[#allocation2 + $0x308] sm:$0xff] %v3151_v0  ;;  %135 = vst [vmem:[#allocation2 + $0x310] sm:$0xff] %v3151_v0  ;;  %2842 = vrot.lane.b32.xlu1 %v2841_v19, %s3152_s0  ;;  %2837 = vrot.lane.b32.xlu0 %v2746_v9, %s3158_s14 }
  0x42   :  { %136 = vst [vmem:[#allocation2 + $0x318] sm:$0xff] %v3151_v0  ;;  %137 = vst [vmem:[#allocation2 + $0x320] sm:$0xff] %v3151_v0 }
  0x43   :  { %138 = vst [vmem:[#allocation2 + $0x328] sm:$0xff] %v3151_v0  ;;  %139 = vst [vmem:[#allocation2 + $0x330] sm:$0xff] %v3151_v0 }
  0x44   :  { %140 = vst [vmem:[#allocation2 + $0x338] sm:$0xff] %v3151_v0  ;;  %141 = vst [vmem:[#allocation2 + $0x340] sm:$0xff] %v3151_v0 }
  0x45   :  { %142 = vst [vmem:[#allocation2 + $0x348] sm:$0xff] %v3151_v0  ;;  %143 = vst [vmem:[#allocation2 + $0x350] sm:$0xff] %v3151_v0  ;;  %2852 = vrot.lane.b32.xlu1 %v2741_v12, %s3159_s15  ;;  %2847 = vrot.lane.b32.xlu0 %v2736_v10, %s3159_s15  ;;  %v3474_v12 = vld [vmem:[#allocation3 + $0x20] sm:$0x3f] }
  0x46   :  { %144 = vst [vmem:[#allocation2 + $0x358] sm:$0xff] %v3151_v0  ;;  %145 = vst [vmem:[#allocation2 + $0x360] sm:$0xff] %v3151_v0 }
  0x47   :  { %146 = vst [vmem:[#allocation2 + $0x368] sm:$0xff] %v3151_v0  ;;  %147 = vst [vmem:[#allocation2 + $0x370] sm:$0xff] %v3151_v0 }
  0x48   :  { %148 = vst [vmem:[#allocation2 + $0x378] sm:$0xff] %v3151_v0  ;;  %149 = vst [vmem:[#allocation2 + $0x380] sm:$0xff] %v3151_v0 }
  0x49   :  { %151 = vst [vmem:[#allocation2 + $0x390] sm:$0xff] %v3151_v0  ;;  %152 = vst [vmem:[#allocation2 + $0x398] sm:$0xff] %v3151_v0  ;;  %2862 = vrot.lane.b32.xlu1 %v2746_v9, %s3159_s15  ;;  %2857 = vrot.lane.b32.xlu0 %v2856_v25, %s3152_s0 }
  0x4a   :  { %153 = vst [vmem:[#allocation2 + $0x3a0] sm:$0xff] %v3151_v0  ;;  %154 = vst [vmem:[#allocation2 + $0x3a8] sm:$0xff] %v3151_v0 }
  0x4b   :  { %155 = vst [vmem:[#allocation2 + $0x3b0] sm:$0xff] %v3151_v0  ;;  %156 = vst [vmem:[#allocation2 + $0x3b8] sm:$0xff] %v3151_v0 }
  0x4c   :  { %157 = vst [vmem:[#allocation2 + $0x3c0] sm:$0xff] %v3151_v0  ;;  %158 = vst [vmem:[#allocation2 + $0x3c8] sm:$0xff] %v3151_v0 }
  0x4d   :  { %159 = vst [vmem:[#allocation2 + $0x3d0] sm:$0xff] %v3151_v0  ;;  %160 = vst [vmem:[#allocation2 + $0x3d8] sm:$0xff] %v3151_v0  ;;  %2872 = vrot.lane.b32.xlu1 %v2841_v19, %s3154_s10  ;;  %2867 = vrot.lane.b32.xlu0 %v2841_v19, %s3153_s9 }
  0x4e   :  { %161 = vst [vmem:[#allocation2 + $0x3e0] sm:$0xff] %v3151_v0  ;;  %162 = vst [vmem:[#allocation2 + $0x3e8] sm:$0xff] %v3151_v0 }
  0x4f   :  { %163 = vst [vmem:[#allocation2 + $0x3f0] sm:$0xff] %v3151_v0  ;;  %164 = vst [vmem:[#allocation2 + $0x3f8] sm:$0xff] %v3151_v0 }
  0x50   :  { %165 = vst [vmem:[#allocation2 + $0x400] sm:$0xff] %v3151_v0  ;;  %166 = vst [vmem:[#allocation2 + $0x408] sm:$0xff] %v3151_v0 }
  0x51   :  { %167 = vst [vmem:[#allocation2 + $0x410] sm:$0xff] %v3151_v0  ;;  %168 = vst [vmem:[#allocation2 + $0x418] sm:$0xff] %v3151_v0  ;;  %2882 = vrot.lane.b32.xlu1 %v2856_v25, %s3154_s10  ;;  %2877 = vrot.lane.b32.xlu0 %v2856_v25, %s3153_s9 }
  0x52   :  { %170 = vst [vmem:[#allocation2 + $0x428] sm:$0xff] %v3151_v0  ;;  %171 = vst [vmem:[#allocation2 + $0x430] sm:$0xff] %v3151_v0 }
  0x53   :  { %172 = vst [vmem:[#allocation2 + $0x438] sm:$0xff] %v3151_v0  ;;  %173 = vst [vmem:[#allocation2 + $0x440] sm:$0xff] %v3151_v0 }
  0x54   :  { %174 = vst [vmem:[#allocation2 + $0x448] sm:$0xff] %v3151_v0  ;;  %175 = vst [vmem:[#allocation2 + $0x450] sm:$0xff] %v3151_v0 }
  0x55   :  { %176 = vst [vmem:[#allocation2 + $0x458] sm:$0xff] %v3151_v0  ;;  %177 = vst [vmem:[#allocation2 + $0x460] sm:$0xff] %v3151_v0  ;;  %2892 = vrot.lane.b32.xlu1 %v2841_v19, %s3156_s12  ;;  %2887 = vrot.lane.b32.xlu0 %v2841_v19, %s3155_s11 }
  0x56   :  { %178 = vst [vmem:[#allocation2 + $0x468] sm:$0xff] %v3151_v0  ;;  %179 = vst [vmem:[#allocation2 + $0x470] sm:$0xff] %v3151_v0 }
  0x57   :  { %180 = vst [vmem:[#allocation2 + $0x478] sm:$0xff] %v3151_v0  ;;  %181 = vst [vmem:[#allocation2 + $0x480] sm:$0xff] %v3151_v0 }
  0x58   :  { %182 = vst [vmem:[#allocation2 + $0x488] sm:$0xff] %v3151_v0  ;;  %183 = vst [vmem:[#allocation2 + $0x490] sm:$0xff] %v3151_v0 }
  0x59   :  { %184 = vst [vmem:[#allocation2 + $0x498] sm:$0xff] %v3151_v0  ;;  %185 = vst [vmem:[#allocation2 + $0x4a0] sm:$0xff] %v3151_v0  ;;  %2902 = vrot.lane.b32.xlu1 %v2856_v25, %s3156_s12  ;;  %2897 = vrot.lane.b32.xlu0 %v2856_v25, %s3155_s11 }
  0x5a   :  { %186 = vst [vmem:[#allocation2 + $0x4a8] sm:$0xff] %v3151_v0  ;;  %187 = vst [vmem:[#allocation2 + $0x4b0] sm:$0xff] %v3151_v0 }
  0x5b   :  { %189 = vst [vmem:[#allocation2 + $0x4c0] sm:$0xff] %v3151_v0  ;;  %190 = vst [vmem:[#allocation2 + $0x4c8] sm:$0xff] %v3151_v0 }
  0x5c   :  { %191 = vst [vmem:[#allocation2 + $0x4d0] sm:$0xff] %v3151_v0  ;;  %192 = vst [vmem:[#allocation2 + $0x4d8] sm:$0xff] %v3151_v0 }
  0x5d   :  { %193 = vst [vmem:[#allocation2 + $0x4e0] sm:$0xff] %v3151_v0  ;;  %194 = vst [vmem:[#allocation2 + $0x4e8] sm:$0xff] %v3151_v0  ;;  %2912 = vrot.lane.b32.xlu1 %v2841_v19, %s3158_s14  ;;  %2907 = vrot.lane.b32.xlu0 %v2841_v19, %s3157_s13 }
  0x5e   :  { %195 = vst [vmem:[#allocation2 + $0x4f0] sm:$0xff] %v3151_v0  ;;  %196 = vst [vmem:[#allocation2 + $0x4f8] sm:$0xff] %v3151_v0 }
  0x5f   :  { %197 = vst [vmem:[#allocation2 + $0x500] sm:$0xff] %v3151_v0  ;;  %198 = vst [vmem:[#allocation2 + $0x508] sm:$0xff] %v3151_v0 }
  0x60   :  { %199 = vst [vmem:[#allocation2 + $0x510] sm:$0xff] %v3151_v0  ;;  %200 = vst [vmem:[#allocation2 + $0x518] sm:$0xff] %v3151_v0 }
  0x61   :  { %201 = vst [vmem:[#allocation2 + $0x520] sm:$0xff] %v3151_v0  ;;  %202 = vst [vmem:[#allocation2 + $0x528] sm:$0xff] %v3151_v0  ;;  %2922 = vrot.lane.b32.xlu1 %v2856_v25, %s3158_s14  ;;  %2917 = vrot.lane.b32.xlu0 %v2856_v25, %s3157_s13 }
  0x62   :  { %203 = vst [vmem:[#allocation2 + $0x530] sm:$0xff] %v3151_v0  ;;  %204 = vst [vmem:[#allocation2 + $0x538] sm:$0xff] %v3151_v0 }
  0x63   :  { %205 = vst [vmem:[#allocation2 + $0x540] sm:$0xff] %v3151_v0  ;;  %206 = vst [vmem:[#allocation2 + $0x548] sm:$0xff] %v3151_v0 }
  0x64   :  { %250 = vst [vmem:[#allocation2] sm:$0xf] %v275_v4  ;;  %251 = vst [vmem:[#allocation2 + $0x8] sm:$0xf] %v295_v7 }
  0x65   :  { %252 = vst [vmem:[#allocation2 + $0x10] sm:$0xf] %v276_v5  ;;  %254 = vst [vmem:[#allocation2 + $0x20] sm:$0xf] %v215_v13  ;;  %2932 = vrot.lane.b32.xlu1 %v2841_v19, %s3159_s15  ;;  %2927 = vrot.lane.b32.xlu0 %v2926_v35, %s3152_s0 }
  0x66   :  { %253 = vst [vmem:[#allocation2 + $0x18] sm:$0xf] %v296_v8  ;;  %255 = vst [vmem:[#allocation2 + $0x28] sm:$0xf] %v234_v15 }
  0x67   :  { %256 = vst [vmem:[#allocation2 + $0x30] sm:$0xf] %v216_v18  ;;  %257 = vst [vmem:[#allocation2 + $0x38] sm:$0xf] %v235_v21  ;;  %v3484_v21 = vunpack.c.l.bf16 %v3474_v12 }
  0x68   :  { %258 = vst [vmem:[#allocation2 + $0x40] sm:$0xf] %v217_v23  ;;  %259 = vst [vmem:[#allocation2 + $0x48] sm:$0xf] %v236_v28 }
  0x69   :  { %260 = vst [vmem:[#allocation2 + $0x50] sm:$0xf] %v218_v29  ;;  %261 = vst [vmem:[#allocation2 + $0x58] sm:$0xf] %v237_v33  ;;  %2942 = vrot.lane.b32.xlu1 %v2856_v25, %s3159_s15  ;;  %2937 = vrot.lane.b32.xlu0 %v2936_v37, %s3152_s0 }
  0x6a   :  { %262 = vst [vmem:[#allocation2 + $0x60] sm:$0xf] %v219_v34  ;;  %263 = vst [vmem:[#allocation2 + $0x68] sm:$0xf] %v238_v40  ;;  %v240_v40 = vcombine.high %v3433_v46, %v3433_v46 }
  0x6b   :  { %264 = vst [vmem:[#allocation2 + $0x70] sm:$0xf] %v220_v41  ;;  %265 = vst [vmem:[#allocation2 + $0x78] sm:$0xf] %v239_v45  ;;  %v1305_v19 = vld [vmem:[#allocation2 + $0x8] sm:$0xff]  ;;  %v1304_v33 = vld [vmem:[#allocation2] sm:$0xff] }
  0x6c   :  { %266 = vst [vmem:[#allocation2 + $0x80] sm:$0xf] %v3433_v46  ;;  %74 = vst.msk [vmem:[#allocation2 + $0x128] sm:$0xff] %vm4256_vm3, %v3151_v0 }
  0x6d   :  { %2952 = vrot.lane.b32.xlu1 %v2926_v35, %s3154_s10  ;;  %2947 = vrot.lane.b32.xlu0 %v2926_v35, %s3153_s9  ;;  %v1307_v34 = vld [vmem:[#allocation2 + $0x18] sm:$0xff]  ;;  %55 = vst.msk [vmem:[#allocation2 + $0x90] sm:$0xff] %vm4256_vm3, %v3151_v0  ;;  %93 = vst.msk [vmem:[#allocation2 + $0x1c0] sm:$0xff] %vm4256_vm3, %v3151_v0 }
  0x6e   :  { %112 = vst.msk [vmem:[#allocation2 + $0x258] sm:$0xff] %vm4256_vm3, %v3151_v0  ;;  %131 = vst.msk [vmem:[#allocation2 + $0x2f0] sm:$0xff] %vm4256_vm3, %v3151_v0 }
  0x6f   :  { %150 = vst.msk [vmem:[#allocation2 + $0x388] sm:$0xff] %vm4256_vm3, %v3151_v0  ;;  %169 = vst.msk [vmem:[#allocation2 + $0x420] sm:$0xff] %vm4256_vm3, %v3151_v0 }
  0x70   :  { %188 = vst.msk [vmem:[#allocation2 + $0x4b8] sm:$0xff] %vm4256_vm3, %v3151_v0  ;;  %207 = vst.msk [vmem:[#allocation2 + $0x550] sm:$0xff] %vm4256_vm3, %v3151_v0 }
  0x71   :  { %2962 = vrot.lane.b32.xlu1 %v2936_v37, %s3154_s10  ;;  %2957 = vrot.lane.b32.xlu0 %v2936_v37, %s3153_s9  ;;  %267 = vst [vmem:[#allocation2 + $0x88] sm:$0xf] %v240_v40  ;;  %269 = vst.msk [vmem:[#allocation2 + $0x90] sm:$0xf] %vm268_vm4, %v222_v38  ;;  %v561_v38 = vcombine.high %v3459_v60, %v3459_v60 }
  0x75   :  { %2972 = vrot.lane.b32.xlu1 %v2926_v35, %s3156_s12  ;;  %2967 = vrot.lane.b32.xlu0 %v2926_v35, %s3155_s11 }
  0x79   :  { %2982 = vrot.lane.b32.xlu1 %v2936_v37, %s3156_s12  ;;  %2977 = vrot.lane.b32.xlu0 %v2936_v37, %s3155_s11 }
  0x7d   :  { %2992 = vrot.lane.b32.xlu1 %v2926_v35, %s3158_s14  ;;  %2987 = vrot.lane.b32.xlu0 %v2926_v35, %s3157_s13 }
  0x81   :  { %3002 = vrot.lane.b32.xlu1 %v2936_v37, %s3158_s14  ;;  %2997 = vrot.lane.b32.xlu0 %v2936_v37, %s3157_s13 }
  0x85   :  { %3012 = vrot.lane.b32.xlu1 %v2926_v35, %s3159_s15  ;;  %3007 = vrot.lane.b32.xlu0 %v3437_v47, %s3152_s0  ;;  %v1306_v35 = vld [vmem:[#allocation2 + $0x10] sm:$0xff] }
  0x89   :  { %3022 = vrot.lane.b32.xlu1 %v2936_v37, %s3159_s15  ;;  %3017 = vrot.lane.b32.xlu0 %v3016_v50, %s3152_s0  ;;  %v3499_v37 = vld [vmem:[#allocation3 + $0x20] sm:$0x3f] }
  0x8b   :  { %v3450_v54 = vpop.permute.xlu1 %2747  ;;  %v2738_v55 = vpop.permute.xlu0 %2737 }
  0x8c   :  { %v2750_v56 = vunpack.i.h.bf16 %v3450_v54  ;;  %v2749_v57 = vunpack.i.l.bf16 %v3450_v54  ;;  %v2740_v58 = vunpack.i.h.bf16 %v2738_v55  ;;  %v2739_v59 = vunpack.i.l.bf16 %v2738_v55 }
  0x8d   :  { %3032 = vrot.lane.b32.xlu1 %v3437_v47, %s3154_s10  ;;  %3027 = vrot.lane.b32.xlu0 %v3437_v47, %s3153_s9 }
  0x8e   :  { %v347_v62 = vsel %vm342_vm0, %v2749_v57, %v2750_v56  ;;  %v344_v63 = vsel %vm342_vm0, %v2739_v59, %v2740_v58 }
  0x8f   :  { %384 = vst [vmem:[#allocation2 + $0xb8] sm:$0xf] %v347_v62  ;;  %381 = vst [vmem:[#allocation2 + $0xa0] sm:$0xf] %v344_v63  ;;  %v2753_v1 = vpop.permute.xlu1 %2752  ;;  %v2743_v2 = vpop.permute.xlu0 %2742  ;;  %v3538_v63 = vunpack.c.l.bf16 %v3497_v36 }
  0x90   :  { %v2755_v3 = vunpack.i.h.bf16 %v2753_v1  ;;  %v2754_v4 = vunpack.i.l.bf16 %v2753_v1  ;;  %v2745_v5 = vunpack.i.h.bf16 %v2743_v2  ;;  %v2744_v6 = vunpack.i.l.bf16 %v2743_v2 }
  0x91   :  { %594 = vrot.lane.b32.xlu1 %v3459_v60, %s3154_s10  ;;  %3037 = vrot.lane.b32.xlu0 %v3036_v61, %s3153_s9  ;;  %v3541_v1 = vunpack.c.l.bf16 %v3499_v37 }
  0x92   :  { %v473_v7 = vsel %vm471_vm1, %v2754_v4, %v2755_v3  ;;  %v346_v8 = vsel %vm342_vm0, %v2745_v5, %v2749_v57  ;;  %v343_v9 = vsel %vm342_vm0, %v2744_v6, %v2739_v59  ;;  %v345_v10 = vsel %vm342_vm0, %v2740_v58, %v2745_v5 }
  0x93   :  { %510 = vst [vmem:[#allocation2 + $0x138] sm:$0xf] %v473_v7  ;;  %380 = vst [vmem:[#allocation2 + $0x98] sm:$0xf] %v343_v9  ;;  %v2763_v13 = vpop.permute.xlu1 %2762  ;;  %v2758_v14 = vpop.permute.xlu0 %2757 }
  0x94   :  { %382 = vst [vmem:[#allocation2 + $0xa8] sm:$0xf] %v345_v10  ;;  %383 = vst [vmem:[#allocation2 + $0xb0] sm:$0xf] %v346_v8  ;;  %v2765_v15 = vunpack.i.h.bf16 %v2763_v13  ;;  %v2764_v16 = vunpack.i.l.bf16 %v2763_v13  ;;  %v2760_v17 = vunpack.i.h.bf16 %v2758_v14  ;;  %v2759_v18 = vunpack.i.l.bf16 %v2758_v14 }
  0x95   :  { %3047 = vrot.lane.b32.xlu1 %v3437_v47, %s3156_s12  ;;  %3042 = vrot.lane.b32.xlu0 %v3437_v47, %s3155_s11 }
  0x96   :  { %v472_v22 = vsel %vm471_vm1, %v2764_v16, %v2754_v4  ;;  %v474_v23 = vsel %vm471_vm1, %v2755_v3, %v2765_v15  ;;  %v602_v24 = vsel %vm600_vm2, %v2759_v18, %v2760_v17  ;;  %v1324_v25 = vld [vmem:[#allocation2 + $0xa0] sm:$0xff]  ;;  %v284_v16 = vunpack.c.h.bf16 %v3425_v39 }
  0x97   :  { %509 = vst [vmem:[#allocation2 + $0x130] sm:$0xf] %v472_v22  ;;  %511 = vst [vmem:[#allocation2 + $0x140] sm:$0xf] %v474_v23  ;;  %v3489_v26 = vpop.permute.xlu1 %2772  ;;  %v2768_v27 = vpop.permute.xlu0 %2767  ;;  %v2566_v28 = vpack.c.bf16 %v1324_v25, %v1305_v19 }
  0x98   :  { %639 = vst [vmem:[#allocation2 + $0x1d0] sm:$0xf] %v602_v24  ;;  %v2775_v29 = vunpack.i.h.bf16 %v3489_v26  ;;  %v2774_v30 = vunpack.i.l.bf16 %v3489_v26  ;;  %v2770_v31 = vunpack.i.h.bf16 %v2768_v27  ;;  %v2769_v32 = vunpack.i.l.bf16 %v2768_v27 }
  0x99   :  { %852 = vrot.lane.b32.xlu1 %v3481_v20, %s3156_s12  ;;  %723 = vrot.lane.b32.xlu0 %v3484_v21, %s3155_s11 }
  0x9a   :  { %v475_v41 = vsel %vm471_vm1, %v2765_v15, %v2774_v30  ;;  %v476_v42 = vsel %vm471_vm1, %v2774_v30, %v2775_v29  ;;  %v601_v43 = vsel %vm600_vm2, %v2769_v32, %v2759_v18  ;;  %v603_v45 = vsel %vm600_vm2, %v2760_v17, %v2770_v31  ;;  %2567 = vmatprep.subr.bf16.mxu0 %v2566_v28  ;;  %v1323_v48 = vld [vmem:[#allocation2 + $0x98] sm:$0xff] }
  0x9b   :  { %v1326_v50 = vld [vmem:[#allocation2 + $0xb0] sm:$0xff]  ;;  %v1325_v51 = vld [vmem:[#allocation2 + $0xa8] sm:$0xff]  ;;  %512 = vst [vmem:[#allocation2 + $0x148] sm:$0xf] %v475_v41  ;;  %513 = vst [vmem:[#allocation2 + $0x150] sm:$0xf] %v476_v42  ;;  %v2783_v44 = vpop.permute.xlu1 %2782  ;;  %v3528_v46 = vpop.permute.xlu0 %2777  ;;  %v2568_v52 = vpack.c.bf16 %v1323_v48, %v1304_v33  ;;  %v413_v28 = vunpack.c.h.bf16 %v3440_v49  ;;  %v671_v30 = vunpack.c.h.bf16 %v3474_v12  ;;  %v542_v49 = vunpack.c.h.bf16 %v3448_v53 }
  0x9c   :  { %638 = vst [vmem:[#allocation2 + $0x1c8] sm:$0xf] %v601_v43  ;;  %640 = vst [vmem:[#allocation2 + $0x1d8] sm:$0xf] %v603_v45  ;;  %v2582_v55 = vpack.c.bf16 %v1326_v50, %v1307_v34  ;;  %v2584_v57 = vpack.c.bf16 %v1325_v51, %v1306_v35  ;;  %v2785_v58 = vunpack.i.h.bf16 %v2783_v44  ;;  %v2784_v59 = vunpack.i.l.bf16 %v2783_v44  ;;  %v1343_v62 = vld [vmem:[#allocation2 + $0x138] sm:$0xff] }
  0x9d   :  { %v2780_v61 = vunpack.i.h.bf16 %v3528_v46  ;;  %v2779_v0 = vunpack.i.l.bf16 %v3528_v46  ;;  %3057 = vrot.lane.b32.xlu1 %v3437_v47, %s3158_s14  ;;  %3052 = vrot.lane.b32.xlu0 %v3437_v47, %s3157_s13  ;;  %v3548_v15 = vld [vmem:[#allocation3 + $0x20] sm:$0x3f]  ;;  %v690_v35 = vcombine.high %v3484_v21, %v3484_v21  ;;  %v929_v12 = vunpack.c.h.bf16 %v3499_v37 }
  0x9e   :  { %v731_v2 = vsel %vm729_vm5, %v2784_v59, %v2785_v58  ;;  %2569 = vmatpush1.bf16.msra.mxu0 %v2568_v52  ;;  %2583 = vmatprep.subr.bf16.mxu1 %v2582_v55  ;;  %v1342_v22 = vld [vmem:[#allocation2 + $0x130] sm:$0xff]  ;;  %v3562_v39 = vunpack.c.l.bf16 %v3548_v15  ;;  %v948_v48 = vcombine.high %v3541_v1, %v3541_v1  ;;  %v800_v50 = vunpack.c.h.bf16 %v3472_v11 }
  0x9f   :  { %v604_v3 = vsel %vm600_vm2, %v2770_v31, %v2779_v0  ;;  %v605_v4 = vsel %vm600_vm2, %v2779_v0, %v2780_v61  ;;  %v1362_v5 = vld [vmem:[#allocation2 + $0x1d0] sm:$0xff]  ;;  %768 = vst [vmem:[#allocation2 + $0x268] sm:$0xf] %v731_v2  ;;  %2585 = vmatpush1.bf16.msra.mxu1 %v2584_v57  ;;  %v2793_v6 = vpop.permute.xlu1 %2792  ;;  %v2788_v7 = vpop.permute.xlu0 %2787  ;;  %v819_v51 = vcombine.high %v3481_v20, %v3481_v20 }
  0xa0   :  { %641 = vst [vmem:[#allocation2 + $0x1e0] sm:$0xf] %v604_v3  ;;  %642 = vst [vmem:[#allocation2 + $0x1e8] sm:$0xf] %v605_v4  ;;  %v2570_v8 = vpack.c.bf16 %v1362_v5, %v1343_v62  ;;  %v2795_v9 = vunpack.i.h.bf16 %v2793_v6  ;;  %v2794_v10 = vunpack.i.l.bf16 %v2793_v6  ;;  %v2790_v13 = vunpack.i.h.bf16 %v2788_v7 }
  0xa1   :  { %v2789_v14 = vunpack.i.l.bf16 %v2788_v7  ;;  %1110 = vrot.lane.b32.xlu1 %v3538_v63, %s3158_s14  ;;  %981 = vrot.lane.b32.xlu0 %v3541_v1, %s3157_s13  ;;  %v3071_v62 = vpack.i.bf16 %v671_v30, %v690_v35  ;;  %v3066_v1 = vpack.i.bf16 %v542_v49, %v561_v38  ;;  %v3081_v7 = vpack.i.bf16 %v929_v12, %v948_v48 }
  0xa2   :  { %v730_v17 = vsel %vm729_vm5, %v2794_v10, %v2784_v59  ;;  %v732_v18 = vsel %vm729_vm5, %v2785_v58, %v2795_v9  ;;  %2571 = vmatprep.subr.bf16.mxu0 %v2570_v8  ;;  %v1345_v43 = vld [vmem:[#allocation2 + $0x148] sm:$0xff]  ;;  %v1344_v58 = vld [vmem:[#allocation2 + $0x140] sm:$0xff]  ;;  %v3076_v8 = vpack.i.bf16 %v800_v50, %v819_v51 }
  0xa3   :  { %v860_v19 = vsel %vm858_vm6, %v2789_v14, %v2790_v13  ;;  %v1361_v23 = vld [vmem:[#allocation2 + $0x1c8] sm:$0xff]  ;;  %767 = vst [vmem:[#allocation2 + $0x260] sm:$0xf] %v730_v17  ;;  %769 = vst [vmem:[#allocation2 + $0x270] sm:$0xf] %v732_v18  ;;  %v3558_v24 = vpop.permute.xlu1 %2802  ;;  %v2798_v25 = vpop.permute.xlu0 %2797  ;;  %v1363_v45 = vld [vmem:[#allocation2 + $0x1d8] sm:$0xff]  ;;  %v1206_v17 = vcombine.high %v3562_v39, %v3562_v39  ;;  %v1058_v18 = vunpack.c.h.bf16 %v3497_v36 }
  0xa4   :  { %897 = vst [vmem:[#allocation2 + $0x300] sm:$0xf] %v860_v19  ;;  %v2572_v27 = vpack.c.bf16 %v1361_v23, %v1342_v22  ;;  %v2805_v31 = vunpack.i.h.bf16 %v3558_v24  ;;  %v2804_v32 = vunpack.i.l.bf16 %v3558_v24  ;;  %v2800_v33 = vunpack.i.h.bf16 %v2798_v25 }
  0xa5   :  { %v2799_v34 = vunpack.i.l.bf16 %v2798_v25  ;;  %3062 = vrot.lane.b32.xlu1 %v3437_v47, %s3159_s15  ;;  %340 = vrot.lane.b32.xlu0 %v284_v16, %s3152_s0  ;;  %v2588_v0 = vpack.c.bf16 %v1363_v45, %v1344_v58  ;;  %v1187_v16 = vunpack.c.h.bf16 %v3548_v15  ;;  %v1077_v19 = vcombine.high %v3538_v63, %v3538_v63 }
  0xa6   :  { %v733_v40 = vsel %vm729_vm5, %v2795_v9, %v2804_v32  ;;  %v734_v41 = vsel %vm729_vm5, %v2804_v32, %v2805_v31  ;;  %v861_v42 = vsel %vm858_vm6, %v2790_v13, %v2800_v33  ;;  %2573 = vmatpush1.bf16.msra.mxu0 %v2572_v27  ;;  %v1381_v59 = vld [vmem:[#allocation2 + $0x268] sm:$0xff] }
  0xa7   :  { %v859_v47 = vsel %vm858_vm6, %v2799_v34, %v2789_v14  ;;  %v1364_v21 = vld [vmem:[#allocation2 + $0x1e0] sm:$0xff]  ;;  %770 = vst [vmem:[#allocation2 + $0x278] sm:$0xf] %v733_v40  ;;  %771 = vst [vmem:[#allocation2 + $0x280] sm:$0xf] %v734_v41  ;;  %v2813_v53 = vpop.permute.xlu1 %2812  ;;  %v3582_v60 = vpop.permute.xlu0 %2807  ;;  %v3091_v34 = vpack.i.bf16 %v1187_v16, %v1206_v17  ;;  %v3086_v35 = vpack.i.bf16 %v1058_v18, %v1077_v19 }
  0xa8   :  { %896 = vst [vmem:[#allocation2 + $0x2f8] sm:$0xf] %v859_v47  ;;  %898 = vst [vmem:[#allocation2 + $0x308] sm:$0xf] %v861_v42  ;;  %v2586_v37 = vpack.c.bf16 %v1364_v21, %v1345_v43  ;;  %v2815_v44 = vunpack.i.h.bf16 %v2813_v53  ;;  %v2814_v52 = vunpack.i.l.bf16 %v2813_v53  ;;  %v2810_v55 = vunpack.i.h.bf16 %v3582_v60 }
  0xa9   :  { %v2809_v57 = vunpack.i.l.bf16 %v3582_v60  ;;  %469 = vrot.lane.b32.xlu1 %v413_v28, %s3153_s9  ;;  %1239 = vrot.lane.b32.xlu0 %v3562_v39, %s3159_s15 }
  0xaa   :  { %v989_v11 = vsel %vm987_vm7, %v2814_v52, %v2815_v44  ;;  %2587 = vmatprep.subr.bf16.mxu1 %v2586_v37  ;;  %v1380_v27 = vld [vmem:[#allocation2 + $0x260] sm:$0xff]  ;;  %v1382_v51 = vld [vmem:[#allocation2 + $0x270] sm:$0xff] }
  0xab   :  { %v862_v20 = vsel %vm858_vm6, %v2800_v33, %v2809_v57  ;;  %v863_v2 = vsel %vm858_vm6, %v2809_v57, %v2810_v55  ;;  %v1400_v3 = vld [vmem:[#allocation2 + $0x300] sm:$0xff]  ;;  %1026 = vst [vmem:[#allocation2 + $0x398] sm:$0xf] %v989_v11  ;;  %2589 = vmatpush1.bf16.msra.mxu1 %v2588_v0  ;;  %v2823_v4 = vpop.permute.xlu1 %2822  ;;  %v2818_v5 = vpop.permute.xlu0 %2817 }
  0xac   :  { %899 = vst [vmem:[#allocation2 + $0x310] sm:$0xf] %v862_v20  ;;  %900 = vst [vmem:[#allocation2 + $0x318] sm:$0xf] %v863_v2  ;;  %v2574_v6 = vpack.c.bf16 %v1400_v3, %v1381_v59  ;;  %v2825_v9 = vunpack.i.h.bf16 %v2823_v4  ;;  %v2824_v10 = vunpack.i.l.bf16 %v2823_v4  ;;  %v2820_v13 = vunpack.i.h.bf16 %v2818_v5 }
  0xad   :  { %v2819_v14 = vunpack.i.l.bf16 %v2818_v5  ;;  %3072 = vrot.lane.b32.xlu1 %v3071_v62, %s3155_s11  ;;  %3067 = vrot.lane.b32.xlu0 %v3066_v1, %s3154_s10 }
  0xae   :  { %v988_v22 = vsel %vm987_vm7, %v2824_v10, %v2814_v52  ;;  %v990_v23 = vsel %vm987_vm7, %v2815_v44, %v2825_v9  ;;  %2575 = vmatprep.subr.bf16.mxu0 %v2574_v6  ;;  %v1383_v41 = vld [vmem:[#allocation2 + $0x278] sm:$0xff] }
  0xaf   :  { %v1118_v25 = vsel %vm1116_vm8, %v2819_v14, %v2820_v13  ;;  %v1399_v28 = vld [vmem:[#allocation2 + $0x2f8] sm:$0xff]  ;;  %1025 = vst [vmem:[#allocation2 + $0x390] sm:$0xf] %v988_v22  ;;  %1027 = vst [vmem:[#allocation2 + $0x3a0] sm:$0xf] %v990_v23  ;;  %v3610_v15 = vpop.permute.xlu1 %2832  ;;  %v2828_v39 = vpop.permute.xlu0 %2827  ;;  %v1401_v42 = vld [vmem:[#allocation2 + $0x308] sm:$0xff] }
  0xb0   :  { %1155 = vst [vmem:[#allocation2 + $0x430] sm:$0xf] %v1118_v25  ;;  %v2576_v30 = vpack.c.bf16 %v1399_v28, %v1380_v27  ;;  %v2835_v36 = vunpack.i.h.bf16 %v3610_v15  ;;  %v2834_v63 = vunpack.i.l.bf16 %v3610_v15  ;;  %v2830_v32 = vunpack.i.h.bf16 %v2828_v39  ;;  %v1302_v25 = vld [vmem:[%s4250_s1] sm:$0xf] }
  0xb1   :  { %v2829_v33 = vunpack.i.l.bf16 %v2828_v39  ;;  %3082 = vrot.lane.b32.xlu1 %v3081_v7, %s3157_s13  ;;  %3077 = vrot.lane.b32.xlu0 %v3076_v8, %s3156_s12  ;;  %v2592_v52 = vpack.c.bf16 %v1401_v42, %v1382_v51  ;;  %v3160_v23 = vmov 0  }
  0xb2   :  { %v991_v49 = vsel %vm987_vm7, %v2825_v9, %v2834_v63  ;;  %v992_v38 = vsel %vm987_vm7, %v2834_v63, %v2835_v36  ;;  %v1119_v40 = vsel %vm1116_vm8, %v2820_v13, %v2830_v32  ;;  %2577 = vmatpush1.bf16.msra.mxu0 %v2576_v30  ;;  %v1419_v44 = vld [vmem:[#allocation2 + $0x398] sm:$0xff]  ;;  %3096 = vset.pattern.permute.xlu0 %v3160_v23 }
  0xb3   :  { %v1117_v12 = vsel %vm1116_vm8, %v2829_v33, %v2819_v14  ;;  %v1402_v47 = vld [vmem:[#allocation2 + $0x310] sm:$0xff]  ;;  %1028 = vst [vmem:[#allocation2 + $0x3a8] sm:$0xf] %v991_v49  ;;  %1029 = vst [vmem:[#allocation2 + $0x3b0] sm:$0xf] %v992_v38  ;;  %v2843_v43 = vpop.permute.xlu1 %2842  ;;  %v3622_v21 = vpop.permute.xlu0 %2837  ;;  %v1475_v14 = vld [vmem:[%s4251_s2] sm:$0xff]  ;;  %3097 = vset.pattern.permute.xlu1 %v3160_v23 }
  0xb4   :  { %1154 = vst [vmem:[#allocation2 + $0x428] sm:$0xf] %v1117_v12  ;;  %1156 = vst [vmem:[#allocation2 + $0x438] sm:$0xf] %v1119_v40  ;;  %v2590_v45 = vpack.c.bf16 %v1402_v47, %v1383_v41  ;;  %v2845_v53 = vunpack.i.h.bf16 %v2843_v43  ;;  %v2844_v37 = vunpack.i.l.bf16 %v2843_v43  ;;  %v2840_v48 = vunpack.i.h.bf16 %v3622_v21  ;;  %v1308_v12 = vld [vmem:[#allocation2 + $0x20] sm:$0xff]  ;;  %v1309_v43 = vld [vmem:[#allocation2 + $0x28] sm:$0xff] }
  0xb5   :  { %v2839_v50 = vunpack.i.l.bf16 %v3622_v21  ;;  %3092 = vrot.lane.b32.xlu1 %v3091_v34, %s3159_s15  ;;  %3087 = vrot.lane.b32.xlu0 %v3086_v35, %s3158_s14 }
  0xb6   :  { %v348_v57 = vsel %vm342_vm0, %v2750_v56, %v2844_v37  ;;  %v349_v58 = vsel %vm342_vm0, %v2844_v37, %v2845_v53  ;;  %2591 = vmatprep.subr.bf16.mxu1 %v2590_v45  ;;  %v1418_v7 = vld [vmem:[#allocation2 + $0x390] sm:$0xff]  ;;  %v1420_v33 = vld [vmem:[#allocation2 + $0x3a0] sm:$0xff]  ;;  %v3661_v37 = vunpack.c.l.bf16 %v1302_v25 }
  0xb7   :  { %v1120_v59 = vsel %vm1116_vm8, %v2830_v32, %v2839_v50  ;;  %v1121_v0 = vsel %vm1116_vm8, %v2839_v50, %v2840_v48  ;;  %v1438_v62 = vld [vmem:[#allocation2 + $0x430] sm:$0xff]  ;;  %385 = vst [vmem:[#allocation2 + $0xc0] sm:$0xf] %v348_v57  ;;  %386 = vst [vmem:[#allocation2 + $0xc8] sm:$0xf] %v349_v58  ;;  %2593 = vmatpush1.bf16.msra.mxu1 %v2592_v52  ;;  %v2853_v1 = vpop.permute.xlu1 %2852  ;;  %v2848_v54 = vpop.permute.xlu0 %2847 }
  0xb8   :  { %1157 = vst [vmem:[#allocation2 + $0x440] sm:$0xf] %v1120_v59  ;;  %1158 = vst [vmem:[#allocation2 + $0x448] sm:$0xf] %v1121_v0  ;;  %v2578_v11 = vpack.c.bf16 %v1438_v62, %v1419_v44  ;;  %v2855_v56 = vunpack.i.h.bf16 %v2853_v1  ;;  %v2854_v20 = vunpack.i.l.bf16 %v2853_v1  ;;  %v2850_v2 = vunpack.i.h.bf16 %v2848_v54 }
  0xb9   :  { %v2849_v3 = vunpack.i.l.bf16 %v2848_v54  ;;  %1478 = vperm.xlu0 %3096, %v1475_v14   ;;  %v1311_v54 = vld [vmem:[#allocation2 + $0x38] sm:$0xff] }
  0xba   :  { %2579 = vmatprep.subr.bf16.mxu0 %v2578_v11  ;;  %v1248_v4 = vsel %vm1245_vm9, %v2850_v2, %v2855_v56  ;;  %v1421_v63 = vld [vmem:[#allocation2 + $0x3a8] sm:$0xff]  ;;  %v1310_v11 = vld [vmem:[#allocation2 + $0x30] sm:$0xff] }
  0xbb   :  { %v1246_v5 = vsel %vm1245_vm9, %v2854_v20, %v2849_v3  ;;  %v1247_v6 = vsel %vm1245_vm9, %v2849_v3, %v2850_v2  ;;  %v1437_v8 = vld [vmem:[#allocation2 + $0x428] sm:$0xff]  ;;  %1285 = vst [vmem:[#allocation2 + $0x4d0] sm:$0xf] %v1248_v4  ;;  %v3639_v9 = vpop.permute.xlu1 %2862  ;;  %v3641_v10 = vpop.permute.xlu0 %2857  ;;  %v1439_v22 = vld [vmem:[#allocation2 + $0x438] sm:$0xff] }
  0xbc   :  { %1283 = vst [vmem:[#allocation2 + $0x4c0] sm:$0xf] %v1246_v5  ;;  %1284 = vst [vmem:[#allocation2 + $0x4c8] sm:$0xf] %v1247_v6  ;;  %v2580_v13 = vpack.c.bf16 %v1437_v8, %v1418_v7  ;;  %v2865_v16 = vunpack.i.h.bf16 %v3639_v9  ;;  %v2864_v17 = vunpack.i.l.bf16 %v3639_v9  ;;  %v2860_v18 = vunpack.i.h.bf16 %v3641_v10 }
  0xbd   :  { %v2859_v19 = vunpack.i.l.bf16 %v3641_v10  ;;  %v2596_v38 = vpack.c.bf16 %v1439_v22, %v1420_v33 }
  0xbe   :  { %2581 = vmatpush1.bf16.msra.mxu0 %v2580_v13  ;;  %v1249_v27 = vsel %vm1245_vm9, %v2855_v56, %v2864_v17  ;;  %v1250_v28 = vsel %vm1245_vm9, %v2864_v17, %v2865_v16  ;;  %v1328_v45 = vld [vmem:[#allocation2 + $0xc0] sm:$0xff]  ;;  %v1329_v56 = vld [vmem:[#allocation2 + $0xc8] sm:$0xff] }
  0xbf   :  { %v350_v39 = vsel %vm342_vm0, %v2845_v53, %v2859_v19  ;;  %v351_v30 = vsel %vm342_vm0, %v2859_v19, %v2860_v18  ;;  %v1440_v32 = vld [vmem:[#allocation2 + $0x440] sm:$0xff]  ;;  %1286 = vst [vmem:[#allocation2 + $0x4d8] sm:$0xf] %v1249_v27  ;;  %1287 = vst [vmem:[#allocation2 + $0x4e0] sm:$0xf] %v1250_v28  ;;  %v2873_v34 = vpop.permute.xlu1 %2872  ;;  %v2868_v35 = vpop.permute.xlu0 %2867  ;;  %v1327_v53 = vld [vmem:[#allocation2 + $0xb8] sm:$0xff]  ;;  %v2616_v17 = vpack.c.bf16 %v1329_v56, %v1310_v11 }
  0xc0   :  { %387 = vst [vmem:[#allocation2 + $0xd0] sm:$0xf] %v350_v39  ;;  %388 = vst [vmem:[#allocation2 + $0xd8] sm:$0xf] %v351_v30  ;;  %v2594_v49 = vpack.c.bf16 %v1440_v32, %v1421_v63  ;;  %v2875_v40 = vunpack.i.h.bf16 %v2873_v34  ;;  %v2874_v41 = vunpack.i.l.bf16 %v2873_v34  ;;  %v2870_v47 = vunpack.i.h.bf16 %v2868_v35  ;;  %v3689_v19 = vld [vmem:[#allocation2 + $0xe0] sm:$0xff]  ;;  %v1346_v28 = vld [vmem:[#allocation2 + $0x150] sm:$0xff] }
  0xc1   :  { %v2869_v42 = vunpack.i.l.bf16 %v2868_v35  ;;  %v2600_v0 = vpack.c.bf16 %v1327_v53, %v1308_v12  ;;  %v1365_v39 = vld [vmem:[#allocation2 + $0x1e8] sm:$0xff]  ;;  %v1403_v11 = vld [vmem:[#allocation2 + $0x318] sm:$0xff] }
  0xc2   :  { %2595 = vmatprep.subr.bf16.mxu1 %v2594_v49  ;;  %v606_v50 = vsel %vm600_vm2, %v2780_v61, %v2874_v41  ;;  %v607_v51 = vsel %vm600_vm2, %v2874_v41, %v2875_v40  ;;  %v2598_v61 = vpack.c.bf16 %v1328_v45, %v1309_v43  ;;  %v1458_v13 = vld [vmem:[#allocation2 + $0x4d0] sm:$0xff] }
  0xc3   :  { %v477_v44 = vsel %vm471_vm1, %v2775_v29, %v2869_v42  ;;  %v478_v52 = vsel %vm471_vm1, %v2869_v42, %v2870_v47  ;;  %2597 = vmatpush1.bf16.msra.mxu1 %v2596_v38  ;;  %v1457_v57 = vld [vmem:[#allocation2 + $0x4c8] sm:$0xff]  ;;  %v1456_v58 = vld [vmem:[#allocation2 + $0x4c0] sm:$0xff]  ;;  %643 = vst [vmem:[#allocation2 + $0x1f0] sm:$0xf] %v606_v50  ;;  %644 = vst [vmem:[#allocation2 + $0x1f8] sm:$0xf] %v607_v51  ;;  %v3671_v59 = vpop.permute.xlu1 %2882  ;;  %v3673_v46 = vpop.permute.xlu0 %2877  ;;  %v2604_v38 = vpack.c.bf16 %v1365_v39, %v1346_v28 }
  0xc4   :  { %514 = vst [vmem:[#allocation2 + $0x158] sm:$0xf] %v477_v44  ;;  %515 = vst [vmem:[#allocation2 + $0x160] sm:$0xf] %v478_v52  ;;  %1501 = vmatprep.subr.mxu0 %v1457_v57  ;;  %v2885_v26 = vunpack.i.h.bf16 %v3671_v59  ;;  %v2884_v29 = vunpack.i.l.bf16 %v3671_v59  ;;  %v2880_v62 = vunpack.i.h.bf16 %v3673_v46  ;;  %v2879_v1 = vunpack.i.l.bf16 %v3673_v46 }
  0xc5   :  { %1502 = vmatpush1.msra.mxu0 %v1456_v58 }
  0xc6   :  { %2599 = vmatprep.subr.bf16.mxu0 %v2598_v61  ;;  %2525 = vmatmul.mubr.msk.f32.vlgmr.msra.gmra.mrb[0].mxu0 %vm1481_vm10, %v3661_v37  ;;  %v608_v20 = vsel %vm600_vm2, %v2875_v40, %v2884_v29  ;;  %v609_v2 = vsel %vm600_vm2, %v2884_v29, %v2885_v26  ;;  %v479_v3 = vsel %vm471_vm1, %v2870_v47, %v2879_v1  ;;  %v1459_v5 = vld [vmem:[#allocation2 + $0x4d8] sm:$0xff] }
  0xc7   :  { %v480_v4 = vsel %vm471_vm1, %v2879_v1, %v2880_v62  ;;  %2601 = vmatpush1.bf16.msra.mxu0 %v2600_v0  ;;  %v1330_v6 = vld [vmem:[#allocation2 + $0xd0] sm:$0xff]  ;;  %645 = vst [vmem:[#allocation2 + $0x200] sm:$0xf] %v608_v20  ;;  %646 = vst [vmem:[#allocation2 + $0x208] sm:$0xf] %v609_v2  ;;  %v2893_v7 = vpop.permute.xlu1 %2892  ;;  %v2888_v8 = vpop.permute.xlu0 %2887  ;;  %1572 = vmatprep.subr.mxu1 %v1459_v5 }
  0xc8   :  { %516 = vst [vmem:[#allocation2 + $0x168] sm:$0xf] %v479_v3  ;;  %517 = vst [vmem:[#allocation2 + $0x170] sm:$0xf] %v480_v4  ;;  %v2614_v14 = vpack.c.bf16 %v1330_v6, %v1311_v54  ;;  %1691 = vmatprep.mubr.f32.mxu0 %v3689_v19  ;;  %v2895_v22 = vunpack.i.h.bf16 %v2893_v7  ;;  %v2894_v23 = vunpack.i.l.bf16 %v2893_v7  ;;  %v2890_v25 = vunpack.i.h.bf16 %v2888_v8  ;;  %1573 = vmatpush1.msra.mxu1 %v1458_v13  ;;  %v1384_v54 = vld [vmem:[#allocation2 + $0x280] sm:$0xff] }
  0xc9   :  { %v2889_v27 = vunpack.i.l.bf16 %v2888_v8  ;;  %2526 = vmatmul.mubr.msk.f32.vlgmr.msra.gmra.mrb[0].mxu1 %vm1481_vm10, %v3661_v37  ;;  %v2608_v7 = vpack.c.bf16 %v1403_v11, %v1384_v54 }
  0xca   :  { %2615 = vmatprep.subr.bf16.mxu1 %v2614_v14  ;;  %v864_v30 = vsel %vm858_vm6, %v2810_v55, %v2894_v23  ;;  %v865_v63 = vsel %vm858_vm6, %v2894_v23, %v2895_v22  ;;  %v1366_v35 = vld [vmem:[#allocation2 + $0x1f0] sm:$0xff]  ;;  %1762 = vmatprep.mubr.f32.mxu1 %v3689_v19  ;;  %v1367_v47 = vld [vmem:[#allocation2 + $0x1f8] sm:$0xff] }
  0xcb   :  { %v735_v32 = vsel %vm729_vm5, %v2805_v31, %v2889_v27  ;;  %v736_v33 = vsel %vm729_vm5, %v2889_v27, %v2890_v25  ;;  %2617 = vmatpush1.bf16.msra.mxu1 %v2616_v17  ;;  %v1347_v34 = vld [vmem:[#allocation2 + $0x158] sm:$0xff]  ;;  %901 = vst [vmem:[#allocation2 + $0x320] sm:$0xf] %v864_v30  ;;  %902 = vst [vmem:[#allocation2 + $0x328] sm:$0xf] %v865_v63  ;;  %v3702_v49 = vpop.permute.xlu1 %2902  ;;  %v3704_v60 = vpop.permute.xlu0 %2897  ;;  %v1348_v41 = vld [vmem:[#allocation2 + $0x160] sm:$0xff] }
  0xcc   :  { %772 = vst [vmem:[#allocation2 + $0x288] sm:$0xf] %v735_v32  ;;  %773 = vst [vmem:[#allocation2 + $0x290] sm:$0xf] %v736_v33  ;;  %v2602_v55 = vpack.c.bf16 %v1366_v35, %v1347_v34  ;;  %v2905_v24 = vunpack.i.h.bf16 %v3702_v49  ;;  %v2904_v31 = vunpack.i.l.bf16 %v3702_v49  ;;  %v2900_v12 = vunpack.i.h.bf16 %v3704_v60 }
  0xcd   :  { %v2899_v40 = vunpack.i.l.bf16 %v3704_v60  ;;  %v2620_v58 = vpack.c.bf16 %v1367_v47, %v1348_v41 }
  0xce   :  { %2603 = vmatprep.subr.bf16.mxu0 %v2602_v55  ;;  %v866_v42 = vsel %vm858_vm6, %v2895_v22, %v2904_v31  ;;  %v867_v43 = vsel %vm858_vm6, %v2904_v31, %v2905_v24  ;;  %v1368_v51 = vld [vmem:[#allocation2 + $0x200] sm:$0xff]  ;;  %v1422_v31 = vld [vmem:[#allocation2 + $0x3b0] sm:$0xff] }
  0xcf   :  { %v737_v45 = vsel %vm729_vm5, %v2890_v25, %v2899_v40  ;;  %v738_v53 = vsel %vm729_vm5, %v2899_v40, %v2900_v12  ;;  %2605 = vmatpush1.bf16.msra.mxu0 %v2604_v38  ;;  %v1349_v50 = vld [vmem:[#allocation2 + $0x168] sm:$0xff]  ;;  %903 = vst [vmem:[#allocation2 + $0x330] sm:$0xf] %v866_v42  ;;  %904 = vst [vmem:[#allocation2 + $0x338] sm:$0xf] %v867_v43  ;;  %v2913_v44 = vpop.permute.xlu1 %2912  ;;  %v2908_v52 = vpop.permute.xlu0 %2907 }
  0xd0   :  { %774 = vst [vmem:[#allocation2 + $0x298] sm:$0xf] %v737_v45  ;;  %775 = vst [vmem:[#allocation2 + $0x2a0] sm:$0xf] %v738_v53  ;;  %v2618_v57 = vpack.c.bf16 %v1368_v51, %v1349_v50  ;;  %v2915_v61 = vunpack.i.h.bf16 %v2913_v44  ;;  %v2914_v0 = vunpack.i.l.bf16 %v2913_v44  ;;  %v2910_v29 = vunpack.i.h.bf16 %v2908_v52  ;;  %v1441_v40 = vld [vmem:[#allocation2 + $0x448] sm:$0xff] }
  0xd1   :  { %v2909_v1 = vunpack.i.l.bf16 %v2908_v52  ;;  %v2612_v51 = vpack.c.bf16 %v1441_v40, %v1422_v31 }
  0xd2   :  { %2619 = vmatprep.subr.bf16.mxu1 %v2618_v57  ;;  %v1122_v56 = vsel %vm1116_vm8, %v2840_v48, %v2914_v0  ;;  %v1123_v20 = vsel %vm1116_vm8, %v2914_v0, %v2915_v61  ;;  %v1404_v5 = vld [vmem:[#allocation2 + $0x320] sm:$0xff]  ;;  %v1405_v17 = vld [vmem:[#allocation2 + $0x328] sm:$0xff] }
  0xd3   :  { %v993_v2 = vsel %vm987_vm7, %v2835_v36, %v2909_v1  ;;  %v994_v3 = vsel %vm987_vm7, %v2909_v1, %v2910_v29  ;;  %2621 = vmatpush1.bf16.msra.mxu1 %v2620_v58  ;;  %v1385_v4 = vld [vmem:[#allocation2 + $0x288] sm:$0xff]  ;;  %1159 = vst [vmem:[#allocation2 + $0x450] sm:$0xf] %v1122_v56  ;;  %1160 = vst [vmem:[#allocation2 + $0x458] sm:$0xf] %v1123_v20  ;;  %v3727_v6 = vpop.permute.xlu1 %2922  ;;  %v3729_v21 = vpop.permute.xlu0 %2917  ;;  %v1386_v14 = vld [vmem:[#allocation2 + $0x290] sm:$0xff] }
  0xd4   :  { %1030 = vst [vmem:[#allocation2 + $0x3b8] sm:$0xf] %v993_v2  ;;  %1031 = vst [vmem:[#allocation2 + $0x3c0] sm:$0xf] %v994_v3  ;;  %v2606_v48 = vpack.c.bf16 %v1404_v5, %v1385_v4  ;;  %v2925_v8 = vunpack.i.h.bf16 %v3727_v6  ;;  %v2924_v15 = vunpack.i.l.bf16 %v3727_v6  ;;  %v2920_v36 = vunpack.i.h.bf16 %v3729_v21 }
  0xd5   :  { %v2919_v13 = vunpack.i.l.bf16 %v3729_v21  ;;  %v2624_v33 = vpack.c.bf16 %v1405_v17, %v1386_v14  ;;  %v1331_v14 = vld [vmem:[#allocation2 + $0xd8] sm:$0xff] }
  0xd6   :  { %2607 = vmatprep.subr.bf16.mxu0 %v2606_v48  ;;  %v1124_v22 = vsel %vm1116_vm8, %v2915_v61, %v2924_v15  ;;  %v1125_v23 = vsel %vm1116_vm8, %v2924_v15, %v2925_v8  ;;  %v1406_v39 = vld [vmem:[#allocation2 + $0x330] sm:$0xff]  ;;  %v1313_v15 = vld [vmem:[#allocation2 + $0x48] sm:$0xff] }
  0xd7   :  { %v995_v25 = vsel %vm987_vm7, %v2910_v29, %v2919_v13  ;;  %v996_v27 = vsel %vm987_vm7, %v2919_v13, %v2920_v36  ;;  %2609 = vmatpush1.bf16.msra.mxu0 %v2608_v7  ;;  %v1387_v28 = vld [vmem:[#allocation2 + $0x298] sm:$0xff]  ;;  %1161 = vst [vmem:[#allocation2 + $0x460] sm:$0xf] %v1124_v22  ;;  %1162 = vst [vmem:[#allocation2 + $0x468] sm:$0xf] %v1125_v23  ;;  %v2933_v30 = vpop.permute.xlu1 %2932  ;;  %v2928_v63 = vpop.permute.xlu0 %2927  ;;  %v1312_v13 = vld [vmem:[#allocation2 + $0x40] sm:$0xff] }
  0xd8   :  { %1032 = vst [vmem:[#allocation2 + $0x3c8] sm:$0xf] %v995_v25  ;;  %1033 = vst [vmem:[#allocation2 + $0x3d0] sm:$0xf] %v996_v27  ;;  %v2622_v32 = vpack.c.bf16 %v1406_v39, %v1387_v28  ;;  %v2935_v34 = vunpack.i.h.bf16 %v2933_v30  ;;  %v2934_v35 = vunpack.i.l.bf16 %v2933_v30  ;;  %v2930_v55 = vunpack.i.h.bf16 %v2928_v63 }
  0xd9   :  { %v2929_v38 = vunpack.i.l.bf16 %v2928_v63  ;;  %v2632_v63 = vpack.c.bf16 %v1331_v14, %v1312_v13 }
  0xda   :  { %2623 = vmatprep.subr.bf16.mxu1 %v2622_v32  ;;  %v1251_v41 = vsel %vm1245_vm9, %v2865_v16, %v2934_v35  ;;  %v1252_v47 = vsel %vm1245_vm9, %v2934_v35, %v2935_v34  ;;  %v1442_v53 = vld [vmem:[#allocation2 + $0x450] sm:$0xff]  ;;  %v1443_v58 = vld [vmem:[#allocation2 + $0x458] sm:$0xff] }
  0xdb   :  { %v352_v42 = vsel %vm342_vm0, %v2860_v18, %v2929_v38  ;;  %v353_v43 = vsel %vm342_vm0, %v2929_v38, %v2930_v55  ;;  %2625 = vmatpush1.bf16.msra.mxu1 %v2624_v33  ;;  %v1423_v45 = vld [vmem:[#allocation2 + $0x3b8] sm:$0xff]  ;;  %1288 = vst [vmem:[#allocation2 + $0x4e8] sm:$0xf] %v1251_v41  ;;  %1289 = vst [vmem:[#allocation2 + $0x4f0] sm:$0xf] %v1252_v47  ;;  %v3751_v50 = vpop.permute.xlu1 %2942  ;;  %v3753_v9 = vpop.permute.xlu0 %2937  ;;  %v1424_v57 = vld [vmem:[#allocation2 + $0x3c0] sm:$0xff] }
  0xdc   :  { %389 = vst [vmem:[#allocation2 + $0xe0] sm:$0xf] %v352_v42  ;;  %390 = vst [vmem:[#allocation2 + $0xe8] sm:$0xf] %v353_v43  ;;  %v2610_v16 = vpack.c.bf16 %v1442_v53, %v1423_v45  ;;  %v2945_v44 = vunpack.i.h.bf16 %v3751_v50  ;;  %v2944_v10 = vunpack.i.l.bf16 %v3751_v50  ;;  %v2940_v18 = vunpack.i.h.bf16 %v3753_v9  ;;  %v1314_v35 = vld [vmem:[#allocation2 + $0x50] sm:$0xff] }
  0xdd   :  { %v2939_v52 = vunpack.i.l.bf16 %v3753_v9  ;;  %v2628_v3 = vpack.c.bf16 %v1443_v58, %v1424_v57 }
  0xde   :  { %2611 = vmatprep.subr.bf16.mxu0 %v2610_v16  ;;  %v1253_v61 = vsel %vm1245_vm9, %v2935_v34, %v2944_v10  ;;  %v1254_v0 = vsel %vm1245_vm9, %v2944_v10, %v2945_v44  ;;  %v1444_v11 = vld [vmem:[#allocation2 + $0x460] sm:$0xff]  ;;  %v1315_v34 = vld [vmem:[#allocation2 + $0x58] sm:$0xff] }
  0xdf   :  { %v354_v29 = vsel %vm342_vm0, %v2930_v55, %v2939_v52  ;;  %v355_v1 = vsel %vm342_vm0, %v2939_v52, %v2940_v18  ;;  %2613 = vmatpush1.bf16.msra.mxu0 %v2612_v51  ;;  %v1425_v54 = vld [vmem:[#allocation2 + $0x3c8] sm:$0xff]  ;;  %1290 = vst [vmem:[#allocation2 + $0x4f8] sm:$0xf] %v1253_v61  ;;  %1291 = vst [vmem:[#allocation2 + $0x500] sm:$0xf] %v1254_v0  ;;  %v2953_v56 = vpop.permute.xlu1 %2952  ;;  %v2948_v20 = vpop.permute.xlu0 %2947  ;;  %v1350_v61 = vld [vmem:[#allocation2 + $0x170] sm:$0xff] }
  0xe0   :  { %391 = vst [vmem:[#allocation2 + $0xf0] sm:$0xf] %v354_v29  ;;  %392 = vst [vmem:[#allocation2 + $0xf8] sm:$0xf] %v355_v1  ;;  %v2626_v2 = vpack.c.bf16 %v1444_v11, %v1425_v54  ;;  %v2955_v4 = vunpack.i.h.bf16 %v2953_v56  ;;  %v2954_v5 = vunpack.i.l.bf16 %v2953_v56  ;;  %v2950_v48 = vunpack.i.h.bf16 %v2948_v20  ;;  %v1369_v0 = vld [vmem:[#allocation2 + $0x208] sm:$0xff] }
  0xe1   :  { %v2949_v7 = vunpack.i.l.bf16 %v2948_v20 }
  0xe2   :  { %2627 = vmatprep.subr.bf16.mxu1 %v2626_v2  ;;  %v610_v17 = vsel %vm600_vm2, %v2885_v26, %v2954_v5  ;;  %v611_v22 = vsel %vm600_vm2, %v2954_v5, %v2955_v4  ;;  %v1461_v27 = vld [vmem:[#allocation2 + $0x4e8] sm:$0xff]  ;;  %v1460_v26 = vld [vmem:[#allocation2 + $0x4e0] sm:$0xff]  ;;  %v1462_v38 = vld [vmem:[#allocation2 + $0x4f0] sm:$0xff] }
  0xe3   :  { %v481_v23 = vsel %vm471_vm1, %v2880_v62, %v2949_v7  ;;  %v482_v25 = vsel %vm471_vm1, %v2949_v7, %v2950_v48  ;;  %2629 = vmatpush1.bf16.msra.mxu1 %v2628_v3  ;;  %v1332_v28 = vld [vmem:[#allocation2 + $0xe0] sm:$0xff]  ;;  %647 = vst [vmem:[#allocation2 + $0x210] sm:$0xf] %v610_v17  ;;  %648 = vst [vmem:[#allocation2 + $0x218] sm:$0xf] %v611_v22  ;;  %v3775_v39 = vpop.permute.xlu1 %2962  ;;  %v3777_v59 = vpop.permute.xlu0 %2957  ;;  %1643 = vmatprep.subr.mxu0 %v1461_v27  ;;  %v1333_v55 = vld [vmem:[#allocation2 + $0xe8] sm:$0xff] }
  0xe4   :  { %518 = vst [vmem:[#allocation2 + $0x178] sm:$0xf] %v481_v23  ;;  %519 = vst [vmem:[#allocation2 + $0x180] sm:$0xf] %v482_v25  ;;  %v2630_v30 = vpack.c.bf16 %v1332_v28, %v1313_v15  ;;  %v2965_v46 = vunpack.i.h.bf16 %v3775_v39  ;;  %v2964_v62 = vunpack.i.l.bf16 %v3775_v39  ;;  %v2960_v32 = vunpack.i.h.bf16 %v3777_v59  ;;  %1644 = vmatpush1.msra.mxu0 %v1460_v26 }
  0xe5   :  { %v2959_v33 = vunpack.i.l.bf16 %v3777_v59  ;;  %2527 = vmatmul.mubr.msk.f32.vlgmr.msra.gmra.mrb[2].mxu0 %vm1481_vm10, %v3661_v37  ;;  %v2648_v51 = vpack.c.bf16 %v1333_v55, %v1314_v35  ;;  %v2636_v3 = vpack.c.bf16 %v1369_v0, %v1350_v61  ;;  %v1407_v35 = vld [vmem:[#allocation2 + $0x338] sm:$0xff] }
  0xe6   :  { %2631 = vmatprep.subr.bf16.mxu0 %v2630_v30  ;;  %v612_v31 = vsel %vm600_vm2, %v2955_v4, %v2964_v62  ;;  %v613_v40 = vsel %vm600_vm2, %v2964_v62, %v2965_v46  ;;  %v1463_v42 = vld [vmem:[#allocation2 + $0x4f8] sm:$0xff]  ;;  %1833 = vmatprep.mubr.f32.mxu0 %v3689_v19 }
  0xe7   :  { %v483_v41 = vsel %vm471_vm1, %v2950_v48, %v2959_v33  ;;  %v484_v47 = vsel %vm471_vm1, %v2959_v33, %v2960_v32  ;;  %2633 = vmatpush1.bf16.msra.mxu0 %v2632_v63  ;;  %v1334_v43 = vld [vmem:[#allocation2 + $0xf0] sm:$0xff]  ;;  %649 = vst [vmem:[#allocation2 + $0x220] sm:$0xf] %v612_v31  ;;  %650 = vst [vmem:[#allocation2 + $0x228] sm:$0xf] %v613_v40  ;;  %v2973_v45 = vpop.permute.xlu1 %2972  ;;  %v2968_v53 = vpop.permute.xlu0 %2967  ;;  %1714 = vmatprep.subr.mxu1 %v1463_v42 }
  0xe8   :  { %520 = vst [vmem:[#allocation2 + $0x188] sm:$0xf] %v483_v41  ;;  %521 = vst [vmem:[#allocation2 + $0x190] sm:$0xf] %v484_v47  ;;  %v2646_v16 = vpack.c.bf16 %v1334_v43, %v1315_v34  ;;  %v2975_v10 = vunpack.i.h.bf16 %v2973_v45  ;;  %v2974_v52 = vunpack.i.l.bf16 %v2973_v45  ;;  %v2970_v57 = vunpack.i.h.bf16 %v2968_v53  ;;  %1715 = vmatpush1.msra.mxu1 %v1462_v38  ;;  %v1388_v34 = vld [vmem:[#allocation2 + $0x2a0] sm:$0xff] }
  0xe9   :  { %v2969_v58 = vunpack.i.l.bf16 %v2968_v53  ;;  %2528 = vmatmul.mubr.msk.f32.vlgmr.msra.gmra.mrb[2].mxu1 %vm1481_vm10, %v3661_v37  ;;  %v2640_v43 = vpack.c.bf16 %v1407_v35, %v1388_v34 }
  0xea   :  { %2647 = vmatprep.subr.bf16.mxu1 %v2646_v16  ;;  %v868_v29 = vsel %vm858_vm6, %v2905_v24, %v2974_v52  ;;  %v869_v1 = vsel %vm858_vm6, %v2974_v52, %v2975_v10  ;;  %v1370_v20 = vld [vmem:[#allocation2 + $0x210] sm:$0xff]  ;;  %1904 = vmatprep.mubr.f32.mxu1 %v3689_v19  ;;  %v1371_v7 = vld [vmem:[#allocation2 + $0x218] sm:$0xff] }
  0xeb   :  { %v739_v54 = vsel %vm729_vm5, %v2900_v12, %v2969_v58  ;;  %v740_v11 = vsel %vm729_vm5, %v2969_v58, %v2970_v57  ;;  %2649 = vmatpush1.bf16.msra.mxu1 %v2648_v51  ;;  %v1351_v56 = vld [vmem:[#allocation2 + $0x178] sm:$0xff]  ;;  %905 = vst [vmem:[#allocation2 + $0x340] sm:$0xf] %v868_v29  ;;  %906 = vst [vmem:[#allocation2 + $0x348] sm:$0xf] %v869_v1  ;;  %v3804_v2 = vpop.permute.xlu1 %2982  ;;  %v3806_v49 = vpop.permute.xlu0 %2977  ;;  %v1352_v48 = vld [vmem:[#allocation2 + $0x180] sm:$0xff] }
  0xec   :  { %776 = vst [vmem:[#allocation2 + $0x2a8] sm:$0xf] %v739_v54  ;;  %777 = vst [vmem:[#allocation2 + $0x2b0] sm:$0xf] %v740_v11  ;;  %v2634_v24 = vpack.c.bf16 %v1370_v20, %v1351_v56  ;;  %v2985_v60 = vunpack.i.h.bf16 %v3804_v2  ;;  %v2984_v12 = vunpack.i.l.bf16 %v3804_v2  ;;  %v2980_v4 = vunpack.i.h.bf16 %v3806_v49 }
  0xed   :  { %v2979_v5 = vunpack.i.l.bf16 %v3806_v49  ;;  %v2652_v26 = vpack.c.bf16 %v1371_v7, %v1352_v48 }
  0xee   :  { %2635 = vmatprep.subr.bf16.mxu0 %v2634_v24  ;;  %v870_v15 = vsel %vm858_vm6, %v2975_v10, %v2984_v12  ;;  %v871_v13 = vsel %vm858_vm6, %v2984_v12, %v2985_v60  ;;  %v1372_v23 = vld [vmem:[#allocation2 + $0x220] sm:$0xff]  ;;  %v1426_v12 = vld [vmem:[#allocation2 + $0x3d0] sm:$0xff] }
  0xef   :  { %v741_v14 = vsel %vm729_vm5, %v2970_v57, %v2979_v5  ;;  %v742_v17 = vsel %vm729_vm5, %v2979_v5, %v2980_v4  ;;  %2637 = vmatpush1.bf16.msra.mxu0 %v2636_v3  ;;  %v1353_v22 = vld [vmem:[#allocation2 + $0x188] sm:$0xff]  ;;  %907 = vst [vmem:[#allocation2 + $0x350] sm:$0xf] %v870_v15  ;;  %908 = vst [vmem:[#allocation2 + $0x358] sm:$0xf] %v871_v13  ;;  %v2993_v25 = vpop.permute.xlu1 %2992  ;;  %v2988_v27 = vpop.permute.xlu0 %2987 }
  0xf0   :  { %778 = vst [vmem:[#allocation2 + $0x2b8] sm:$0xf] %v741_v14  ;;  %779 = vst [vmem:[#allocation2 + $0x2c0] sm:$0xf] %v742_v17  ;;  %v2650_v28 = vpack.c.bf16 %v1372_v23, %v1353_v22  ;;  %v2995_v30 = vunpack.i.h.bf16 %v2993_v25  ;;  %v2994_v63 = vunpack.i.l.bf16 %v2993_v25  ;;  %v2990_v62 = vunpack.i.h.bf16 %v2988_v27  ;;  %v1445_v5 = vld [vmem:[#allocation2 + $0x468] sm:$0xff] }
  0xf1   :  { %v2989_v33 = vunpack.i.l.bf16 %v2988_v27  ;;  %v2644_v23 = vpack.c.bf16 %v1445_v5, %v1426_v12 }
  0xf2   :  { %2651 = vmatprep.subr.bf16.mxu1 %v2650_v28  ;;  %v1126_v55 = vsel %vm1116_vm8, %v2925_v8, %v2994_v63  ;;  %v1127_v38 = vsel %vm1116_vm8, %v2994_v63, %v2995_v30  ;;  %v1408_v47 = vld [vmem:[#allocation2 + $0x340] sm:$0xff]  ;;  %v1409_v51 = vld [vmem:[#allocation2 + $0x348] sm:$0xff] }
  0xf3   :  { %v997_v31 = vsel %vm987_vm7, %v2920_v36, %v2989_v33  ;;  %v998_v40 = vsel %vm987_vm7, %v2989_v33, %v2990_v62  ;;  %2653 = vmatpush1.bf16.msra.mxu1 %v2652_v26  ;;  %v1389_v41 = vld [vmem:[#allocation2 + $0x2a8] sm:$0xff]  ;;  %1163 = vst [vmem:[#allocation2 + $0x470] sm:$0xf] %v1126_v55  ;;  %1164 = vst [vmem:[#allocation2 + $0x478] sm:$0xf] %v1127_v38  ;;  %v3829_v42 = vpop.permute.xlu1 %3002  ;;  %v3831_v6 = vpop.permute.xlu0 %2997  ;;  %v1390_v16 = vld [vmem:[#allocation2 + $0x2b0] sm:$0xff] }
  0xf4   :  { %1034 = vst [vmem:[#allocation2 + $0x3d8] sm:$0xf] %v997_v31  ;;  %1035 = vst [vmem:[#allocation2 + $0x3e0] sm:$0xf] %v998_v40  ;;  %v2638_v8 = vpack.c.bf16 %v1408_v47, %v1389_v41  ;;  %v3005_v45 = vunpack.i.h.bf16 %v3829_v42  ;;  %v3004_v21 = vunpack.i.l.bf16 %v3829_v42  ;;  %v3000_v36 = vunpack.i.h.bf16 %v3831_v6 }
  0xf5   :  { %v2999_v53 = vunpack.i.l.bf16 %v3831_v6  ;;  %v2656_v11 = vpack.c.bf16 %v1409_v51, %v1390_v16  ;;  %v1335_v16 = vld [vmem:[#allocation2 + $0xf8] sm:$0xff] }
  0xf6   :  { %2639 = vmatprep.subr.bf16.mxu0 %v2638_v8  ;;  %v1128_v10 = vsel %vm1116_vm8, %v2995_v30, %v3004_v21  ;;  %v1129_v52 = vsel %vm1116_vm8, %v3004_v21, %v3005_v45  ;;  %v1410_v0 = vld [vmem:[#allocation2 + $0x350] sm:$0xff]  ;;  %v1317_v21 = vld [vmem:[#allocation2 + $0x68] sm:$0xff] }
  0xf7   :  { %v999_v57 = vsel %vm987_vm7, %v2990_v62, %v2999_v53  ;;  %v1000_v58 = vsel %vm987_vm7, %v2999_v53, %v3000_v36  ;;  %2641 = vmatpush1.bf16.msra.mxu0 %v2640_v43  ;;  %v1391_v61 = vld [vmem:[#allocation2 + $0x2b8] sm:$0xff]  ;;  %1165 = vst [vmem:[#allocation2 + $0x480] sm:$0xf] %v1128_v10  ;;  %1166 = vst [vmem:[#allocation2 + $0x488] sm:$0xf] %v1129_v52  ;;  %v3013_v29 = vpop.permute.xlu1 %3012  ;;  %v3008_v1 = vpop.permute.xlu0 %3007  ;;  %v1316_v53 = vld [vmem:[#allocation2 + $0x60] sm:$0xff] }
  0xf8   :  { %1036 = vst [vmem:[#allocation2 + $0x3e8] sm:$0xf] %v999_v57  ;;  %1037 = vst [vmem:[#allocation2 + $0x3f0] sm:$0xf] %v1000_v58  ;;  %v2654_v54 = vpack.c.bf16 %v1410_v0, %v1391_v61  ;;  %v3015_v56 = vunpack.i.h.bf16 %v3013_v29  ;;  %v3014_v20 = vunpack.i.l.bf16 %v3013_v29  ;;  %v3010_v24 = vunpack.i.h.bf16 %v3008_v1 }
  0xf9   :  { %v3009_v3 = vunpack.i.l.bf16 %v3008_v1 }
  0xfa   :  { %2655 = vmatprep.subr.bf16.mxu1 %v2654_v54  ;;  %v1255_v48 = vsel %vm1245_vm9, %v2945_v44, %v3014_v20  ;;  %v1256_v7 = vsel %vm1245_vm9, %v3014_v20, %v3015_v56  ;;  %v1446_v17 = vld [vmem:[#allocation2 + $0x470] sm:$0xff]  ;;  %v1447_v26 = vld [vmem:[#allocation2 + $0x478] sm:$0xff]  ;;  %v2664_v54 = vpack.c.bf16 %v1335_v16, %v1316_v53 }
  0xfb   :  { %v356_v15 = vsel %vm342_vm0, %v2940_v18, %v3009_v3  ;;  %v357_v13 = vsel %vm342_vm0, %v3009_v3, %v3010_v24  ;;  %2657 = vmatpush1.bf16.msra.mxu1 %v2656_v11  ;;  %v1427_v14 = vld [vmem:[#allocation2 + $0x3d8] sm:$0xff]  ;;  %1292 = vst [vmem:[#allocation2 + $0x508] sm:$0xf] %v1255_v48  ;;  %1293 = vst [vmem:[#allocation2 + $0x510] sm:$0xf] %v1256_v7  ;;  %v3853_v22 = vpop.permute.xlu1 %3022  ;;  %v3855_v50 = vpop.permute.xlu0 %3017  ;;  %v1428_v28 = vld [vmem:[#allocation2 + $0x3e0] sm:$0xff] }
  0xfc   :  { %393 = vst [vmem:[#allocation2 + $0x100] sm:$0xf] %v356_v15  ;;  %394 = vst [vmem:[#allocation2 + $0x108] sm:$0xf] %v357_v13  ;;  %v2642_v44 = vpack.c.bf16 %v1446_v17, %v1427_v14  ;;  %v3025_v25 = vunpack.i.h.bf16 %v3853_v22  ;;  %v3024_v9 = vunpack.i.l.bf16 %v3853_v22  ;;  %v3020_v18 = vunpack.i.h.bf16 %v3855_v50  ;;  %v1319_v11 = vld [vmem:[#allocation2 + $0x78] sm:$0xff] }
  0xfd   :  { %v3019_v27 = vunpack.i.l.bf16 %v3855_v50  ;;  %v2660_v40 = vpack.c.bf16 %v1447_v26, %v1428_v28  ;;  %v1373_v28 = vld [vmem:[#allocation2 + $0x228] sm:$0xff] }
  0xfe   :  { %2643 = vmatprep.subr.bf16.mxu0 %v2642_v44  ;;  %v1257_v30 = vsel %vm1245_vm9, %v3015_v56, %v3024_v9  ;;  %v1258_v63 = vsel %vm1245_vm9, %v3024_v9, %v3025_v25  ;;  %v1448_v35 = vld [vmem:[#allocation2 + $0x480] sm:$0xff]  ;;  %v1318_v56 = vld [vmem:[#allocation2 + $0x70] sm:$0xff] }
  0xff   :  { %v358_v62 = vsel %vm342_vm0, %v3010_v24, %v3019_v27  ;;  %v359_v33 = vsel %vm342_vm0, %v3019_v27, %v3020_v18  ;;  %2645 = vmatpush1.bf16.msra.mxu0 %v2644_v23  ;;  %v1429_v34 = vld [vmem:[#allocation2 + $0x3e8] sm:$0xff]  ;;  %1294 = vst [vmem:[#allocation2 + $0x518] sm:$0xf] %v1257_v30  ;;  %1295 = vst [vmem:[#allocation2 + $0x520] sm:$0xf] %v1258_v63  ;;  %v3033_v55 = vpop.permute.xlu1 %3032  ;;  %v3028_v38 = vpop.permute.xlu0 %3027  ;;  %v1354_v27 = vld [vmem:[#allocation2 + $0x190] sm:$0xff] }
 0x100   :  { %395 = vst [vmem:[#allocation2 + $0x110] sm:$0xf] %v358_v62  ;;  %396 = vst [vmem:[#allocation2 + $0x118] sm:$0xf] %v359_v33  ;;  %v2658_v31 = vpack.c.bf16 %v1448_v35, %v1429_v34  ;;  %v3035_v41 = vunpack.i.h.bf16 %v3033_v55  ;;  %v3034_v47 = vunpack.i.l.bf16 %v3033_v55  ;;  %v3030_v8 = vunpack.i.h.bf16 %v3028_v38 }
 0x101   :  { %v3029_v43 = vunpack.i.l.bf16 %v3028_v38  ;;  %v2668_v55 = vpack.c.bf16 %v1373_v28, %v1354_v27 }
 0x102   :  { %2659 = vmatprep.subr.bf16.mxu1 %v2658_v31  ;;  %v614_v51 = vsel %vm600_vm2, %v2965_v46, %v3034_v47  ;;  %v615_v10 = vsel %vm600_vm2, %v3034_v47, %v3035_v41  ;;  %v1465_v58 = vld [vmem:[#allocation2 + $0x508] sm:$0xff]  ;;  %v1464_v46 = vld [vmem:[#allocation2 + $0x500] sm:$0xff]  ;;  %v1466_v24 = vld [vmem:[#allocation2 + $0x510] sm:$0xff] }
 0x103   :  { %v485_v52 = vsel %vm471_vm1, %v2960_v32, %v3029_v43  ;;  %v486_v57 = vsel %vm471_vm1, %v3029_v43, %v3030_v8  ;;  %2661 = vmatpush1.bf16.msra.mxu1 %v2660_v40  ;;  %v1336_v61 = vld [vmem:[#allocation2 + $0x100] sm:$0xff]  ;;  %651 = vst [vmem:[#allocation2 + $0x230] sm:$0xf] %v614_v51  ;;  %652 = vst [vmem:[#allocation2 + $0x238] sm:$0xf] %v615_v10  ;;  %v3877_v0 = vpop.permute.xlu1 %594  ;;  %v3879_v39 = vpop.permute.xlu0 %3037  ;;  %1785 = vmatprep.subr.mxu0 %v1465_v58  ;;  %v1337_v20 = vld [vmem:[#allocation2 + $0x108] sm:$0xff] }
 0x104   :  { %522 = vst [vmem:[#allocation2 + $0x198] sm:$0xf] %v485_v52  ;;  %523 = vst [vmem:[#allocation2 + $0x1a0] sm:$0xf] %v486_v57  ;;  %v2662_v29 = vpack.c.bf16 %v1336_v61, %v1317_v21  ;;  %v616_v59 = vsel %vm600_vm2, %v3035_v41, %v3877_v0  ;;  %v3040_v32 = vunpack.i.h.bf16 %v3879_v39  ;;  %v3039_v1 = vunpack.i.l.bf16 %v3879_v39  ;;  %1786 = vmatpush1.msra.mxu0 %v1464_v46  ;;  %v1392_v10 = vld [vmem:[#allocation2 + $0x2c0] sm:$0xff]  ;;  %v1411_v52 = vld [vmem:[#allocation2 + $0x358] sm:$0xff] }
 0x105   :  { %653 = vst [vmem:[#allocation2 + $0x240] sm:$0xf] %v616_v59  ;;  %2529 = vmatmul.mubr.msk.f32.vlgmr.msra.gmra.mrb[4].mxu0 %vm1481_vm10, %v3661_v37  ;;  %v2680_v14 = vpack.c.bf16 %v1337_v20, %v1318_v56  ;;  %v2672_v56 = vpack.c.bf16 %v1411_v52, %v1392_v10  ;;  %v1322_v52 = vld [vmem:[#allocation2 + $0x90] sm:$0xff] }
 0x106   :  { %2663 = vmatprep.subr.bf16.mxu0 %v2662_v29  ;;  %v487_v3 = vsel %vm471_vm1, %v3030_v8, %v3039_v1  ;;  %v488_v12 = vsel %vm471_vm1, %v3039_v1, %v3040_v32  ;;  %v1467_v5 = vld [vmem:[#allocation2 + $0x518] sm:$0xff]  ;;  %1975 = vmatprep.mubr.f32.mxu0 %v3689_v19 }
 0x107   :  { %2665 = vmatpush1.bf16.msra.mxu0 %v2664_v54  ;;  %v1338_v48 = vld [vmem:[#allocation2 + $0x110] sm:$0xff]  ;;  %524 = vst [vmem:[#allocation2 + $0x1a8] sm:$0xf] %v487_v3  ;;  %525 = vst [vmem:[#allocation2 + $0x1b0] sm:$0xf] %v488_v12  ;;  %v3048_v7 = vpop.permute.xlu1 %3047  ;;  %v3043_v15 = vpop.permute.xlu0 %3042  ;;  %1856 = vmatprep.subr.mxu1 %v1467_v5 }
 0x108   :  { %v2678_v13 = vpack.c.bf16 %v1338_v48, %v1319_v11  ;;  %v3050_v17 = vunpack.i.h.bf16 %v3048_v7  ;;  %v3049_v44 = vunpack.i.l.bf16 %v3048_v7  ;;  %v3045_v23 = vunpack.i.h.bf16 %v3043_v15  ;;  %1857 = vmatpush1.msra.mxu1 %v1466_v24 }
 0x109   :  { %v3044_v9 = vunpack.i.l.bf16 %v3043_v15  ;;  %2530 = vmatmul.mubr.msk.f32.vlgmr.msra.gmra.mrb[4].mxu1 %vm1481_vm10, %v3661_v37 }
 0x10a   :  { %2679 = vmatprep.subr.bf16.mxu1 %v2678_v13  ;;  %v872_v26 = vsel %vm858_vm6, %v2985_v60, %v3049_v44  ;;  %v873_v30 = vsel %vm858_vm6, %v3049_v44, %v3050_v17  ;;  %v1374_v34 = vld [vmem:[#allocation2 + $0x230] sm:$0xff]  ;;  %2046 = vmatprep.mubr.f32.mxu1 %v3689_v19  ;;  %v1375_v40 = vld [vmem:[#allocation2 + $0x238] sm:$0xff] }
 0x10b   :  { %v743_v63 = vsel %vm729_vm5, %v2980_v4, %v3044_v9  ;;  %v744_v62 = vsel %vm729_vm5, %v3044_v9, %v3045_v23  ;;  %2681 = vmatpush1.bf16.msra.mxu1 %v2680_v14  ;;  %v1355_v33 = vld [vmem:[#allocation2 + $0x198] sm:$0xff]  ;;  %909 = vst [vmem:[#allocation2 + $0x360] sm:$0xf] %v872_v26  ;;  %910 = vst [vmem:[#allocation2 + $0x368] sm:$0xf] %v873_v30  ;;  %v3902_v35 = vpop.permute.xlu1 %852  ;;  %v3904_v2 = vpop.permute.xlu0 %723  ;;  %v1356_v31 = vld [vmem:[#allocation2 + $0x1a0] sm:$0xff] }
 0x10c   :  { %780 = vst [vmem:[#allocation2 + $0x2c8] sm:$0xf] %v743_v63  ;;  %781 = vst [vmem:[#allocation2 + $0x2d0] sm:$0xf] %v744_v62  ;;  %v2666_v60 = vpack.c.bf16 %v1374_v34, %v1355_v33  ;;  %v874_v49 = vsel %vm858_vm6, %v3050_v17, %v3902_v35  ;;  %v745_v4 = vsel %vm729_vm5, %v3045_v23, %v3904_v2  ;;  %v1376_v38 = vld [vmem:[#allocation2 + $0x240] sm:$0xff]  ;;  %v1430_v14 = vld [vmem:[#allocation2 + $0x3f0] sm:$0xff] }
 0x10d   :  { %911 = vst [vmem:[#allocation2 + $0x370] sm:$0xf] %v874_v49  ;;  %782 = vst [vmem:[#allocation2 + $0x2d8] sm:$0xf] %v745_v4  ;;  %v2684_v21 = vpack.c.bf16 %v1375_v40, %v1356_v31  ;;  %v1449_v17 = vld [vmem:[#allocation2 + $0x488] sm:$0xff] }
 0x10e   :  { %2667 = vmatprep.subr.bf16.mxu0 %v2666_v60  ;;  %v1357_v41 = vld [vmem:[#allocation2 + $0x1a8] sm:$0xff] }
 0x10f   :  { %2669 = vmatpush1.bf16.msra.mxu0 %v2668_v55  ;;  %v3058_v47 = vpop.permute.xlu1 %3057  ;;  %v3053_v8 = vpop.permute.xlu0 %3052  ;;  %v2682_v43 = vpack.c.bf16 %v1376_v38, %v1357_v41  ;;  %v1321_v31 = vld [vmem:[#allocation2 + $0x88] sm:$0xff] }
 0x110   :  { %v3060_v19 = vunpack.i.h.bf16 %v3058_v47  ;;  %v3059_v53 = vunpack.i.l.bf16 %v3058_v47  ;;  %v3055_v16 = vunpack.i.h.bf16 %v3053_v8  ;;  %v3054_v51 = vunpack.i.l.bf16 %v3053_v8 }
 0x111   :  { %2683 = vmatprep.subr.bf16.mxu1 %v2682_v43 }
 0x112   :  { %v1130_v57 = vsel %vm1116_vm8, %v3005_v45, %v3059_v53  ;;  %v1131_v58 = vsel %vm1116_vm8, %v3059_v53, %v3060_v19  ;;  %v1001_v61 = vsel %vm987_vm7, %v3000_v36, %v3054_v51  ;;  %v1002_v46 = vsel %vm987_vm7, %v3054_v51, %v3055_v16  ;;  %2685 = vmatpush1.bf16.msra.mxu1 %v2684_v21  ;;  %v1412_v59 = vld [vmem:[#allocation2 + $0x360] sm:$0xff]  ;;  %v1413_v11 = vld [vmem:[#allocation2 + $0x368] sm:$0xff]  ;;  %v1339_v53 = vld [vmem:[#allocation2 + $0x118] sm:$0xff] }
 0x113   :  { %v1393_v29 = vld [vmem:[#allocation2 + $0x2c8] sm:$0xff]  ;;  %1167 = vst [vmem:[#allocation2 + $0x490] sm:$0xf] %v1130_v57  ;;  %1168 = vst [vmem:[#allocation2 + $0x498] sm:$0xf] %v1131_v58  ;;  %v3919_v1 = vpop.permute.xlu1 %1110  ;;  %v3921_v42 = vpop.permute.xlu0 %981  ;;  %v1394_v54 = vld [vmem:[#allocation2 + $0x2d0] sm:$0xff] }
 0x114   :  { %1038 = vst [vmem:[#allocation2 + $0x3f8] sm:$0xf] %v1001_v61  ;;  %1039 = vst [vmem:[#allocation2 + $0x400] sm:$0xf] %v1002_v46  ;;  %v2670_v45 = vpack.c.bf16 %v1412_v59, %v1393_v29  ;;  %v1132_v6 = vsel %vm1116_vm8, %v3060_v19, %v3919_v1  ;;  %v1003_v36 = vsel %vm987_vm7, %v3055_v16, %v3921_v42  ;;  %v1395_v20 = vld [vmem:[#allocation2 + $0x2d8] sm:$0xff]  ;;  %v1414_v24 = vld [vmem:[#allocation2 + $0x370] sm:$0xff] }
 0x115   :  { %1169 = vst [vmem:[#allocation2 + $0x4a0] sm:$0xf] %v1132_v6  ;;  %1040 = vst [vmem:[#allocation2 + $0x408] sm:$0xf] %v1003_v36  ;;  %v2686_v3 = vpack.c.bf16 %v1414_v24, %v1395_v20  ;;  %v2688_v12 = vpack.c.bf16 %v1413_v11, %v1394_v54  ;;  %v1320_v19 = vld [vmem:[#allocation2 + $0x80] sm:$0xff] }
 0x116   :  { %2671 = vmatprep.subr.bf16.mxu0 %v2670_v45  ;;  %v1468_v51 = vld [vmem:[#allocation2 + $0x520] sm:$0xff]  ;;  %v2696_v45 = vpack.c.bf16 %v1339_v53, %v1320_v19 }
 0x117   :  { %2673 = vmatpush1.bf16.msra.mxu0 %v2672_v56  ;;  %v3063_v5 = vpop.permute.xlu1 %3062  ;;  %v341_v48 = vpop.permute.xlu0 %340  ;;  %2687 = vmatprep.subr.bf16.mxu1 %v2686_v3 }
 0x118   :  { %v3065_v7 = vunpack.i.h.bf16 %v3063_v5  ;;  %v3064_v15 = vunpack.i.l.bf16 %v3063_v5  ;;  %v360_v13 = vsel %vm342_vm0, %v3020_v18, %v341_v48  ;;  %398 = vst.msk [vmem:[#allocation2 + $0x128] sm:$0xf] %vm268_vm4, %v341_v48  ;;  %2689 = vmatpush1.bf16.msra.mxu1 %v2688_v12 }
 0x119   :  { %397 = vst [vmem:[#allocation2 + $0x120] sm:$0xf] %v360_v13  ;;  %v3101_v13 = vld [vmem:[#allocation2 + $0x4a8] sm:$0xff] }
 0x11a   :  { %v1259_v44 = vsel %vm1245_vm9, %v3025_v25, %v3064_v15  ;;  %v1260_v23 = vsel %vm1245_vm9, %v3064_v15, %v3065_v7  ;;  %v1450_v27 = vld [vmem:[#allocation2 + $0x490] sm:$0xff]  ;;  %v1451_v30 = vld [vmem:[#allocation2 + $0x498] sm:$0xff]  ;;  %v2676_v25 = vpack.c.bf16 %v1449_v17, %v1430_v14 }
 0x11b   :  { %v1431_v9 = vld [vmem:[#allocation2 + $0x3f8] sm:$0xff]  ;;  %1296 = vst [vmem:[#allocation2 + $0x528] sm:$0xf] %v1259_v44  ;;  %1297 = vst [vmem:[#allocation2 + $0x530] sm:$0xf] %v1260_v23  ;;  %v470_v28 = vpop.permute.xlu1 %469  ;;  %v3935_v50 = vpop.permute.xlu0 %1239  ;;  %v1432_v26 = vld [vmem:[#allocation2 + $0x400] sm:$0xff] }
 0x11c   :  { %v2674_v18 = vpack.c.bf16 %v1450_v27, %v1431_v9  ;;  %v489_v63 = vsel %vm471_vm1, %v3040_v32, %v470_v28  ;;  %527 = vst.msk [vmem:[#allocation2 + $0x1c0] sm:$0xf] %vm268_vm4, %v470_v28  ;;  %v1261_v22 = vsel %vm1245_vm9, %v3065_v7, %v3935_v50  ;;  %v1433_v62 = vld [vmem:[#allocation2 + $0x408] sm:$0xff]  ;;  %v1452_v33 = vld [vmem:[#allocation2 + $0x4a0] sm:$0xff]  ;;  %v2692_v60 = vpack.c.bf16 %v1451_v30, %v1432_v26  ;;  %v1358_v15 = vld [vmem:[#allocation2 + $0x1b0] sm:$0xff] }
 0x11d   :  { %526 = vst [vmem:[#allocation2 + $0x1b8] sm:$0xf] %v489_v63  ;;  %1298 = vst [vmem:[#allocation2 + $0x538] sm:$0xf] %v1261_v22  ;;  %v2690_v34 = vpack.c.bf16 %v1452_v33, %v1433_v62 }
 0x11e   :  { %2675 = vmatprep.subr.bf16.mxu0 %v2674_v18 }
 0x11f   :  { %2677 = vmatpush1.bf16.msra.mxu0 %v2676_v25  ;;  %v3073_v49 = vpop.permute.xlu1 %3072  ;;  %v3068_v4 = vpop.permute.xlu0 %3067  ;;  %2691 = vmatprep.subr.bf16.mxu1 %v2690_v34  ;;  %v1341_v59 = vld [vmem:[#allocation2 + $0x128] sm:$0xff] }
 0x120   :  { %v3075_v39 = vunpack.i.h.bf16 %v3073_v49  ;;  %v3074_v55 = vunpack.i.l.bf16 %v3073_v49  ;;  %v3070_v32 = vunpack.i.h.bf16 %v3068_v4  ;;  %v3069_v38 = vunpack.i.l.bf16 %v3068_v4  ;;  %2693 = vmatpush1.bf16.msra.mxu1 %v2692_v60  ;;  %v1340_v40 = vld [vmem:[#allocation2 + $0x120] sm:$0xff] }
 0x121   :  { %v2694_v10 = vpack.c.bf16 %v1340_v40, %v1321_v31  ;;  %v2711_v20 = vpack.c.bf16 %v1341_v59, %v1322_v52 }
 0x122   :  { %v746_v41 = vsel %vm729_vm5, %v3904_v2, %v3074_v55  ;;  %v747_v47 = vsel %vm729_vm5, %v3074_v55, %v3075_v39  ;;  %785 = vst.msk [vmem:[#allocation2 + $0x2f0] sm:$0xf] %vm268_vm4, %v3075_v39  ;;  %v617_v8 = vsel %vm600_vm2, %v3877_v0, %v3069_v38  ;;  %v618_v43 = vsel %vm600_vm2, %v3069_v38, %v3070_v32  ;;  %v1469_v21 = vld [vmem:[#allocation2 + $0x528] sm:$0xff]  ;;  %v1470_v29 = vld [vmem:[#allocation2 + $0x530] sm:$0xff] }
 0x123   :  { %656 = vst.msk [vmem:[#allocation2 + $0x258] sm:$0xf] %vm268_vm4, %v3070_v32  ;;  %783 = vst [vmem:[#allocation2 + $0x2e0] sm:$0xf] %v746_v41  ;;  %v3083_v16 = vpop.permute.xlu1 %3082  ;;  %v3078_v2 = vpop.permute.xlu0 %3077  ;;  %1927 = vmatprep.subr.mxu0 %v1469_v21  ;;  %v1360_v48 = vld [vmem:[#allocation2 + $0x1c0] sm:$0xff] }
 0x124   :  { %784 = vst [vmem:[#allocation2 + $0x2e8] sm:$0xf] %v747_v47  ;;  %654 = vst [vmem:[#allocation2 + $0x248] sm:$0xf] %v617_v8  ;;  %v3085_v57 = vunpack.i.h.bf16 %v3083_v16  ;;  %v3084_v58 = vunpack.i.l.bf16 %v3083_v16  ;;  %v3080_v0 = vunpack.i.h.bf16 %v3078_v2  ;;  %v3079_v61 = vunpack.i.l.bf16 %v3078_v2  ;;  %1928 = vmatpush1.msra.mxu0 %v1468_v51  ;;  %v1471_v46 = vld [vmem:[#allocation2 + $0x538] sm:$0xff] }
 0x125   :  { %655 = vst [vmem:[#allocation2 + $0x250] sm:$0xf] %v618_v43  ;;  %2531 = vmatmul.mubr.msk.f32.vlgmr.msra.gmra.mrb[6].mxu0 %vm1481_vm10, %v3661_v37  ;;  %1998 = vmatprep.subr.mxu1 %v1471_v46  ;;  %v1359_v9 = vld [vmem:[#allocation2 + $0x1b8] sm:$0xff] }
 0x126   :  { %v1004_v54 = vsel %vm987_vm7, %v3921_v42, %v3084_v58  ;;  %v1005_v11 = vsel %vm987_vm7, %v3084_v58, %v3085_v57  ;;  %1043 = vst.msk [vmem:[#allocation2 + $0x420] sm:$0xf] %vm268_vm4, %v3085_v57  ;;  %v875_v6 = vsel %vm858_vm6, %v3902_v35, %v3079_v61  ;;  %v876_v36 = vsel %vm858_vm6, %v3079_v61, %v3080_v0  ;;  %v2194_v61 = vld [vmem:[%s4254_s5] sm:$0xff] }
 0x127   :  { %914 = vst.msk [vmem:[#allocation2 + $0x388] sm:$0xf] %vm268_vm4, %v3080_v0  ;;  %2695 = vmatprep.subr.bf16.mxu0 %v2694_v10  ;;  %1041 = vst [vmem:[#allocation2 + $0x410] sm:$0xf] %v1004_v54  ;;  %1999 = vmatpush1.msra.mxu1 %v1470_v29  ;;  %v3093_v56 = vpop.permute.xlu1 %3092  ;;  %v3088_v42 = vpop.permute.xlu0 %3087  ;;  %v3161_v35 = vmov 0.0|0.0   ;;  %v2200_v57 = vlaneseq }
 0x128   :  { %1042 = vst [vmem:[#allocation2 + $0x418] sm:$0xf] %v1005_v11  ;;  %912 = vst [vmem:[#allocation2 + $0x378] sm:$0xf] %v875_v6  ;;  %2697 = vmatpush1.bf16.msra.mxu0 %v2696_v45  ;;  %v3095_v24 = vunpack.i.h.bf16 %v3093_v56  ;;  %v3094_v3 = vunpack.i.l.bf16 %v3093_v56  ;;  %v3090_v12 = vunpack.i.h.bf16 %v3088_v42  ;;  %v3089_v5 = vunpack.i.l.bf16 %v3088_v42  ;;  %2532 = vmatmul.mubr.msk.f32.vlgmr.msra.gmra.mrb[6].mxu1 %vm1481_vm10, %v3661_v37 }
 0x129   :  { %913 = vst [vmem:[#allocation2 + $0x380] sm:$0xf] %v876_v36  ;;  %2710 = vmatprep.subr.bf16.mxu1 %v3161_v35  ;;  %2563 = vmatprep.mubr.msk.f32.mxu1 %vm3162_vm11, %v3101_v13  ;;  %v1398_v30 = vld [vmem:[#allocation2 + $0x2f0] sm:$0xff]  ;;  %v3975_v58 = vshrl.u32 %v2200_v57, 7 }
 0x12a   :  { %2712 = vmatpush3.bf16.msra.mxu1 %v2711_v20  ;;  %v1379_v7 = vld [vmem:[#allocation2 + $0x258] sm:$0xff]  ;;  %v1262_v14 = vsel %vm1245_vm9, %v3935_v50, %v3094_v3  ;;  %v1263_v17 = vsel %vm1245_vm9, %v3094_v3, %v3095_v24  ;;  %1301 = vst.msk [vmem:[#allocation2 + $0x550] sm:$0xf] %vm268_vm4, %v3095_v24  ;;  %v1133_v44 = vsel %vm1116_vm8, %v3919_v1, %v3089_v5  ;;  %1172 = vst.msk [vmem:[#allocation2 + $0x4b8] sm:$0xf] %vm268_vm4, %v3090_v12  ;;  %v1396_v62 = vld [vmem:[#allocation2 + $0x2e0] sm:$0xff] }
 0x12b   :  { %v1134_v23 = vsel %vm1116_vm8, %v3089_v5, %v3090_v12  ;;  %2713 = vmatprep.subr.bf16.mxu1 %v3161_v35  ;;  %v1377_v28 = vld [vmem:[#allocation2 + $0x248] sm:$0xff]  ;;  %1299 = vst [vmem:[#allocation2 + $0x540] sm:$0xf] %v1262_v14  ;;  %1300 = vst [vmem:[#allocation2 + $0x548] sm:$0xf] %v1263_v17  ;;  %v2714_v50 = vpack.c.bf16 %v1379_v7, %v1360_v48  ;;  %2117 = vmatprep.mubr.f32.mxu0 %v3101_v13  ;;  %v3978_v0 = vsub.s32 0, %v3975_v58 }
 0x12c   :  { %v1378_v27 = vld [vmem:[#allocation2 + $0x250] sm:$0xff]  ;;  %1170 = vst [vmem:[#allocation2 + $0x4a8] sm:$0xf] %v1133_v44  ;;  %1171 = vst [vmem:[#allocation2 + $0x4b0] sm:$0xf] %v1134_v23  ;;  %v2700_v26 = vpack.c.bf16 %v1377_v28, %v1358_v15  ;;  %v1397_v63 = vld [vmem:[#allocation2 + $0x2e8] sm:$0xff] }
 0x12d   :  { %v2698_v18 = vpack.c.bf16 %v1378_v27, %v1359_v9  ;;  %v1436_v49 = vld [vmem:[#allocation2 + $0x420] sm:$0xff]  ;;  %v2203_v29 = vrot.slane %v2194_v61, %v3978_v0  ;;  %v3997_v11 = vsub.s32 2, %v3975_v58  ;;  %v2214_v6 = vsub.s32 3, %v3975_v58 }
 0x12e   :  { %2715 = vmatpush3.bf16.msra.mxu1 %v2714_v50  ;;  %v1417_v1 = vld [vmem:[#allocation2 + $0x388] sm:$0xff]  ;;  %v1434_v38 = vld [vmem:[#allocation2 + $0x410] sm:$0xff]  ;;  %v2218_v5 = vsub.s32 4, %v3975_v58  ;;  %v2222_v23 = vsub.s32 5, %v3975_v58 }
 0x12f   :  { %2699 = vmatprep.subr.bf16.mxu0 %v2698_v18  ;;  %2716 = vmatprep.subr.bf16.mxu1 %v3161_v35  ;;  %v2717_v22 = vpack.c.bf16 %v1417_v1, %v1398_v30  ;;  %v1415_v33 = vld [vmem:[#allocation2 + $0x378] sm:$0xff]  ;;  %v2211_v20 = vrot.slane %v2194_v61, %v3997_v11  ;;  %v2215_v12 = vrot.slane %v2194_v61, %v2214_v6  ;;  %v2226_v30 = vsub.s32 6, %v3975_v58 }
 0x130   :  { %2701 = vmatpush1.bf16.msra.mxu0 %v2700_v26  ;;  %v1416_v25 = vld [vmem:[#allocation2 + $0x380] sm:$0xff]  ;;  %v2704_v60 = vpack.c.bf16 %v1415_v33, %v1396_v62  ;;  %v1435_v4 = vld [vmem:[#allocation2 + $0x418] sm:$0xff]  ;;  %v2219_v44 = vrot.slane %v2194_v61, %v2218_v5  ;;  %v2223_v26 = vrot.slane %v2194_v61, %v2222_v23 }
 0x131   :  { %v2702_v34 = vpack.c.bf16 %v1416_v25, %v1397_v63  ;;  %v1455_v39 = vld [vmem:[#allocation2 + $0x4b8] sm:$0xff]  ;;  %v1474_v8 = vld [vmem:[#allocation2 + $0x550] sm:$0xff]  ;;  %v2227_v33 = vrot.slane %v2194_v61, %v2226_v30 }
 0x132   :  { %2718 = vmatpush3.bf16.msra.mxu1 %v2717_v22  ;;  %v2720_v55 = vpack.c.bf16 %v1455_v39, %v1436_v49  ;;  %v1473_v47 = vld [vmem:[#allocation2 + $0x548] sm:$0xff]  ;;  %v1472_v43 = vld [vmem:[#allocation2 + $0x540] sm:$0xff] }
 0x133   :  { %2703 = vmatprep.subr.bf16.mxu0 %v2702_v34  ;;  %2719 = vmatprep.subr.bf16.mxu1 %v3161_v35  ;;  %v1454_v32 = vld [vmem:[#allocation2 + $0x4b0] sm:$0xff]  ;;  %v1453_v31 = vld [vmem:[#allocation2 + $0x4a8] sm:$0xff]  ;;  %v2230_v34 = vsub.s32 7, %v3975_v58 }
 0x134   :  { %2705 = vmatpush1.bf16.msra.mxu0 %v2704_v60  ;;  %v2706_v40 = vpack.c.bf16 %v1454_v32, %v1435_v4  ;;  %v2708_v41 = vpack.c.bf16 %v1453_v31, %v1434_v38  ;;  %v2195_v38 = vld [vmem:[%s4254_s5 + $0x8] sm:$0xff] }
 0x135   :  { %v2231_v32 = vrot.slane %v2194_v61, %v2230_v34 }
 0x136   :  { %2721 = vmatpush3.bf16.msra.mxu1 %v2720_v55  ;;  %2707 = vmatprep.subr.bf16.mxu0 %v2706_v40 }
 0x137   :  { %2561 = vmatprep.subr.mxu1 %v3101_v13 }
 0x138   :  { %2709 = vmatpush1.bf16.msra.mxu0 %v2708_v41  ;;  %v3986_v46 = vpop.permute.xlu0 %1478 }
 0x139   :  { %2069 = vmatprep.subr.mxu0 %v1473_v47 }
 0x13a   :  { %2562 = vmatpush3.msra.mxu1 %v1474_v8 }
 0x13b   :  { %2564 = vmatmul.mubr.msk.f32.vlgmr.msra.gmra.mrb[8].mxu1 %vm1481_vm10, %v3661_v37 }
 0x13c   :  { %2070 = vmatpush1.msra.mxu0 %v1472_v43 }
 0x13d   :  { %2533 = vmatmul.mubr.msk.f32.vlgmr.msra.gmra.mrb[8].mxu0 %vm1481_vm10, %v3661_v37  ;;  %v3984_v37 = vsub.s32 1, %v3975_v58 }
 0x13f   :  { %v2207_v54 = vrot.slane %v2194_v61, %v3984_v37 }
 0x199   :  { %v1551_v21 = vpop.f32.mrb[0].mxu0 }
 0x19a   :  { %v1553_v19 = vpop.f32.mrb[1].mxu0  ;;  %v3990_v59 = vadd.f32 %v1551_v21, %v3986_v46  ;;  %v2235_v21 = vrot.slane %v2195_v38, %v3978_v0 }
 0x19b   :  { %v3993_v45 = vadd.f32 %v1553_v19, %v3986_v46 }
 0x19c   :  { %v1622_v53 = vpop.f32.mrb[0].mxu1  ;;  %v2295_v36 = vmul.f32 %v2203_v29, %v3990_v59  ;;  %v2243_v29 = vrot.slane %v2195_v38, %v3997_v11 }
 0x19d   :  { %v1624_v16 = vpop.f32.mrb[1].mxu1  ;;  %v2296_v56 = vmul.f32 %v2207_v54, %v3993_v45  ;;  %v4003_v42 = vadd.f32 %v1622_v53, %v3986_v46 }
 0x19e   :  { %v2335_v35 = vmul.f32 %v2295_v36, %v3990_v59  ;;  %v4011_v15 = vadd.f32 %v1624_v16, %v3986_v46 }
 0x19f   :  { %v2336_v48 = vmul.f32 %v2296_v56, %v3993_v45  ;;  %v2297_v7 = vmul.f32 %v2211_v20, %v4003_v42  ;;  %v2314_v14 = vadd.f32 %v2296_v56, %v2295_v36 }
 0x1a0   :  { %v2298_v28 = vmul.f32 %v2215_v12, %v4011_v15 }
 0x1a1   :  { %v2354_v9 = vadd.f32 %v2336_v48, %v2335_v35  ;;  %v2337_v27 = vmul.f32 %v2297_v7, %v4003_v42  ;;  %v2315_v18 = vadd.f32 %v2314_v14, %v2297_v7  ;;  %v2247_v35 = vrot.slane %v2195_v38, %v2214_v6 }
 0x1a2   :  { %v2338_v1 = vmul.f32 %v2298_v28, %v4011_v15 }
 0x1a3   :  { %v2355_v63 = vadd.f32 %v2354_v9, %v2337_v27  ;;  %v2316_v62 = vadd.f32 %v2315_v18, %v2298_v28 }
 0x1a5   :  { %v2356_v60 = vadd.f32 %v2355_v63, %v2338_v1 }
 0x1b8   :  { %v1693_v2 = vpop.f32.mrb[2].mxu0 }
 0x1b9   :  { %v1695_v51 = vpop.f32.mrb[3].mxu0  ;;  %v4019_v50 = vadd.f32 %v1693_v2, %v3986_v46 }
 0x1ba   :  { %v4027_v25 = vadd.f32 %v1695_v51, %v3986_v46 }
 0x1bb   :  { %v2299_v22 = vmul.f32 %v2219_v44, %v4019_v50 }
 0x1bc   :  { %v1764_v10 = vpop.f32.mrb[2].mxu1  ;;  %v2300_v4 = vmul.f32 %v2223_v26, %v4027_v25 }
 0x1bd   :  { %v1766_v52 = vpop.f32.mrb[3].mxu1  ;;  %v2339_v49 = vmul.f32 %v2299_v22, %v4019_v50  ;;  %v4035_v39 = vadd.f32 %v1764_v10, %v3986_v46  ;;  %v2317_v55 = vadd.f32 %v2316_v62, %v2299_v22 }
 0x1be   :  { %v2340_v40 = vmul.f32 %v2300_v4, %v4027_v25  ;;  %v4045_v47 = vadd.f32 %v1766_v52, %v3986_v46  ;;  %v2239_v52 = vrot.slane %v2195_v38, %v3984_v37 }
 0x1bf   :  { %v2357_v31 = vadd.f32 %v2356_v60, %v2339_v49  ;;  %v2301_v41 = vmul.f32 %v2227_v33, %v4035_v39  ;;  %v2318_v8 = vadd.f32 %v2317_v55, %v2300_v4  ;;  %v2255_v33 = vrot.slane %v2195_v38, %v2222_v23 }
 0x1c0   :  { %v2302_v16 = vmul.f32 %v2231_v32, %v4045_v47 }
 0x1c1   :  { %v2358_v19 = vadd.f32 %v2357_v31, %v2340_v40  ;;  %v2341_v53 = vmul.f32 %v2301_v41, %v4035_v39  ;;  %v2319_v2 = vadd.f32 %v2318_v8, %v2301_v41  ;;  %v2259_v41 = vrot.slane %v2195_v38, %v2226_v30 }
 0x1c2   :  { %v2342_v61 = vmul.f32 %v2302_v16, %v4045_v47 }
 0x1c3   :  { %v2359_v57 = vadd.f32 %v2358_v19, %v2341_v53  ;;  %v2320_v54 = vadd.f32 %v2319_v2, %v2302_v16  ;;  %v2263_v16 = vrot.slane %v2195_v38, %v2230_v34  ;;  %v2196_v2 = vld [vmem:[%s4254_s5 + $0x10] sm:$0x7] }
 0x1c4   :  { %v2271_v34 = vrot.slane %v2196_v2, %v3984_v37 }
 0x1d8   :  { %v1835_v24 = vpop.f32.mrb[4].mxu0 }
 0x1d9   :  { %v1837_v3 = vpop.f32.mrb[5].mxu0  ;;  %v4048_v43 = vadd.f32 %v1835_v24, %v3986_v46  ;;  %v2360_v24 = vadd.f32 %v2359_v57, %v2342_v61 }
 0x1da   :  { %v4055_v10 = vadd.f32 %v1837_v3, %v3986_v46 }
 0x1db   :  { %v2303_v51 = vmul.f32 %v2235_v21, %v4048_v43 }
 0x1dc   :  { %v1906_v13 = vpop.f32.mrb[4].mxu1  ;;  %v2304_v56 = vmul.f32 %v2239_v52, %v4055_v10  ;;  %v2275_v52 = vrot.slane %v2196_v2, %v3997_v11 }
 0x1dd   :  { %v1908_v17 = vpop.f32.mrb[5].mxu1  ;;  %v2343_v36 = vmul.f32 %v2303_v51, %v4048_v43  ;;  %v4063_v20 = vadd.f32 %v1906_v13, %v3986_v46  ;;  %v2321_v12 = vadd.f32 %v2320_v54, %v2303_v51  ;;  %v2251_v13 = vrot.slane %v2195_v38, %v2218_v5 }
 0x1de   :  { %v2344_v7 = vmul.f32 %v2304_v56, %v4055_v10  ;;  %v4068_v44 = vadd.f32 %v1908_v17, %v3986_v46  ;;  %v2267_v54 = vrot.slane %v2196_v2, %v3978_v0 }
 0x1df   :  { %v2361_v48 = vadd.f32 %v2360_v24, %v2343_v36  ;;  %v2305_v14 = vmul.f32 %v2243_v29, %v4063_v20  ;;  %v2322_v27 = vadd.f32 %v2321_v12, %v2304_v56 }
 0x1e0   :  { %v2306_v1 = vmul.f32 %v2247_v35, %v4068_v44 }
 0x1e1   :  { %v2362_v6 = vadd.f32 %v2361_v48, %v2344_v7  ;;  %v2345_v63 = vmul.f32 %v2305_v14, %v4063_v20  ;;  %v2323_v22 = vadd.f32 %v2322_v27, %v2305_v14 }
 0x1e2   :  { %v2346_v49 = vmul.f32 %v2306_v1, %v4068_v44 }
 0x1e3   :  { %v2363_v60 = vadd.f32 %v2362_v6, %v2345_v63  ;;  %v2324_v5 = vadd.f32 %v2323_v22, %v2306_v1 }
 0x1e5   :  { %v2364_v32 = vadd.f32 %v2363_v60, %v2346_v49 }
 0x1f8   :  { %v1977_v3 = vpop.f32.mrb[6].mxu0 }
 0x1f9   :  { %v1979_v9 = vpop.f32.mrb[7].mxu0  ;;  %v4071_v28 = vadd.f32 %v1977_v3, %v3986_v46 }
 0x1fa   :  { %v4079_v17 = vadd.f32 %v1979_v9, %v3986_v46 }
 0x1fb   :  { %v2048_v18 = vpop.f32.mrb[6].mxu1  ;;  %v2307_v62 = vmul.f32 %v2251_v13, %v4071_v28 }
 0x1fc   :  { %v2050_v26 = vpop.f32.mrb[7].mxu1  ;;  %v2308_v55 = vmul.f32 %v2255_v33, %v4079_v17  ;;  %v4087_v40 = vadd.f32 %v2048_v18, %v3986_v46 }
 0x1fd   :  { %v2347_v4 = vmul.f32 %v2307_v62, %v4071_v28  ;;  %v2325_v31 = vadd.f32 %v2324_v5, %v2307_v62  ;;  %v4094_v53 = vadd.f32 %v2050_v26, %v3986_v46 }
 0x1fe   :  { %v2348_v21 = vmul.f32 %v2308_v55, %v4079_v17  ;;  %v2309_v19 = vmul.f32 %v2259_v41, %v4087_v40 }
 0x1ff   :  { %v2365_v8 = vadd.f32 %v2364_v32, %v2347_v4  ;;  %v2326_v23 = vadd.f32 %v2325_v31, %v2308_v55  ;;  %v2310_v61 = vmul.f32 %v2263_v16, %v4094_v53  ;;  %v2381_v32 = vld [vmem:[%s4252_s3] sm:$0xff]  ;;  %s3163_s3 = smov [#allocation6]  }
 0x200   :  { %v2349_v57 = vmul.f32 %v2309_v19, %v4087_v40 }
 0x201   :  { %v2366_v51 = vadd.f32 %v2365_v8, %v2348_v21  ;;  %v2327_v30 = vadd.f32 %v2326_v23, %v2309_v19  ;;  %v2350_v48 = vmul.f32 %v2310_v61, %v4094_v53  ;;  %v2383_v8 = vld [vmem:[%s4253_s4] sm:$0xff]  ;;  %s2516_s4 = sshll.u32 %s3163_s3, 4  ;;  %s2517_s4 = int_to_ptr.vmem [resolvable:$true] %s2516_s4 }
 0x202   :  { %s3124_s27 = scalar_lea.vmem %s2517_s4, 2432  ;;  %p3129_p9 = scmp.lt.s32.totalorder %s2517_s4, %s2517_s4 }
 0x203   :  { %v2367_v56 = vadd.f32 %v2366_v51, %v2349_v57  ;;  %v2328_v3 = vadd.f32 %v2327_v30, %v2310_v61  ;;  %p3125_p8 = scmp.ne.s32.totalorder %s2517_s4, %s3124_s27  ;;  %p3130_p10 = scmp.lt.s32.totalorder %s3124_s27, %s3124_s27 }
 0x205   :  { %v2368_v14 = vadd.f32 %v2367_v56, %v2350_v48  ;;  %p3131_p11 = por %p3130_p10, %p3129_p9 }
 0x207   :  { %p3132_p12 = pnand %p3131_p11, %p3125_p8 }
 0x20e   :  { %v2190_v29 = vpop.f32.mrb[8].mxu1 }
 0x20f   :  { %v4106_v36 = vadd.f32 %v2190_v29, %v3986_v46  ;;  %v2565_v38 = vpop.f32.mrb[9].mxu1 }
 0x210   :  { %v2119_v58 = vpop.f32.mrb[8].mxu0 }
 0x211   :  { %v2120_v24 = vadd.f32 %v2119_v58, %v3986_v46  ;;  %v2121_v12 = vpop.f32.mrb[9].mxu0  ;;  %v2313_v35 = vmul.f32 %v2275_v52, %v4106_v36 }
 0x212   :  { %v2122_v11 = vadd.f32 %v2121_v12, %v3986_v46 }
 0x213   :  { %v2311_v7 = vmul.f32 %v2267_v54, %v2120_v24  ;;  %v2353_v37 = vmul.f32 %v2313_v35, %v4106_v36  ;;  %v2331_v6 = vsel %vm4256_vm3, %v2313_v35, 0.0 }
 0x214   :  { %v2312_v0 = vmul.f32 %v2271_v34, %v2122_v11 }
 0x215   :  { %v2351_v9 = vmul.f32 %v2311_v7, %v2120_v24  ;;  %v2329_v27 = vadd.f32 %v2328_v3, %v2311_v7  ;;  %v2371_v46 = vsel %vm4256_vm3, %v2353_v37, 0.0 }
 0x216   :  { %v2352_v13 = vmul.f32 %v2312_v0, %v2122_v11 }
 0x217   :  { %v2330_v18 = vadd.f32 %v2329_v27, %v2312_v0  ;;  %v2369_v26 = vadd.f32 %v2368_v14, %v2351_v9 }
 0x219   :  { %v2332_v63 = vadd.f32 %v2331_v6, %v2330_v18  ;;  %v2370_v1 = vadd.f32 %v2369_v26, %v2352_v13 }
 0x21b   :  { %2333 = vadd.xlane.f32.xlu1 %v2332_v63  ;;  %v2372_v22 = vadd.f32 %v2371_v46, %v2370_v1 }
 0x21d   :  { %2373 = vadd.xlane.f32.xlu0 %v2372_v22 }
 0x2a8   :  { %v2334_v62 = vpop.xlane.xlu1 %2333 }
 0x2a9   :  { %v2375_v33 = vmul.f32 0.00048828125, %v2334_v62 }
 0x2aa   :  { %v2374_v60 = vpop.xlane.xlu0 %2373 }
 0x2ab   :  { %v2377_v49 = vmul.f32 %v2375_v33, %v2375_v33  ;;  %v2376_v5 = vmul.f32 0.00048828125, %v2374_v60 }
 0x2ad   :  { %v2378_v4 = vsub.f32 %v2376_v5, %v2377_v49 }
 0x2af   :  { %v2379_v55 = vadd.f32 1e-05, %v2378_v4 }
 0x2b1   :  { %3098 = vrsqrt.f32 %v2379_v55 }
 0x2bb   :  { %v3099_v31 = vpop.eup %3098 }
 0x2bc   :  { %v2382_v41 = vmul.f32 %v3099_v31, %v2381_v32 }
 0x2be   :  { %2388 = vperm.xlu1 %3097, %v2382_v41   ;;  %v2384_v21 = vmul.f32 %v2382_v41, %v2375_v33 }
 0x2c0   :  { %v2385_v23 = vsub.f32 %v2383_v8, %v2384_v21 }
 0x2c2   :  { %2412 = vperm.xlu0 %3096, %v2385_v23  }
 0x33d   :  { %v2389_v19 = vpop.permute.xlu1 %2388 }
 0x33e   :  { %v2391_v16 = vmul.f32 %v2389_v19, %v3990_v59  ;;  %v2392_v2 = vmul.f32 %v2389_v19, %v3993_v45  ;;  %v2393_v51 = vmul.f32 %v2389_v19, %v4003_v42  ;;  %v2394_v52 = vmul.f32 %v2389_v19, %v4011_v15 }
 0x33f   :  { %v2395_v30 = vmul.f32 %v2389_v19, %v4019_v50  ;;  %v2396_v57 = vmul.f32 %v2389_v19, %v4027_v25  ;;  %v2397_v61 = vmul.f32 %v2389_v19, %v4035_v39  ;;  %v2398_v29 = vmul.f32 %v2389_v19, %v4045_v47 }
 0x340   :  { %v2399_v54 = vmul.f32 %v2389_v19, %v4048_v43  ;;  %v2400_v58 = vmul.f32 %v2389_v19, %v4055_v10  ;;  %v2401_v59 = vmul.f32 %v2389_v19, %v4063_v20  ;;  %v2402_v45 = vmul.f32 %v2389_v19, %v4068_v44 }
 0x341   :  { %v2403_v42 = vmul.f32 %v2389_v19, %v4071_v28  ;;  %v2404_v15 = vmul.f32 %v2389_v19, %v4079_v17  ;;  %v2405_v50 = vmul.f32 %v2389_v19, %v4087_v40  ;;  %v2413_v34 = vpop.permute.xlu0 %2412  ;;  %v2406_v25 = vmul.f32 %v2389_v19, %v4094_v53 }
 0x342   :  { %v2407_v39 = vmul.f32 %v2389_v19, %v2120_v24  ;;  %v2408_v38 = vmul.f32 %v2389_v19, %v2122_v11  ;;  %v2409_v47 = vmul.f32 %v2389_v19, %v4106_v36  ;;  %v2415_v43 = vadd.f32 %v2413_v34, %v2391_v16 }
 0x343   :  { %v2416_v56 = vadd.f32 %v2413_v34, %v2392_v2  ;;  %v2417_v10 = vadd.f32 %v2413_v34, %v2393_v51  ;;  %v2418_v12 = vadd.f32 %v2413_v34, %v2394_v52  ;;  %v2419_v20 = vadd.f32 %v2413_v34, %v2395_v30 }
 0x344   :  { %v2420_v35 = vadd.f32 %v2413_v34, %v2396_v57  ;;  %v4139_v44 = vadd.f32 %v2413_v34, %v2397_v61  ;;  %v4141_v28 = vadd.f32 %v2413_v34, %v2398_v29  ;;  %v4143_v17 = vadd.f32 %v2413_v34, %v2399_v54 }
 0x345   :  { %v4145_v40 = vadd.f32 %v2413_v34, %v2400_v58  ;;  %v4147_v3 = vadd.f32 %v2413_v34, %v2401_v59  ;;  %v4149_v53 = vadd.f32 %v2413_v34, %v2402_v45  ;;  %v4151_v24 = vadd.f32 %v2413_v34, %v2403_v42 }
 0x346   :  { %v4153_v36 = vadd.f32 %v2413_v34, %v2404_v15  ;;  %v4155_v11 = vadd.f32 %v2413_v34, %v2405_v50  ;;  %v4157_v48 = vadd.f32 %v2413_v34, %v2406_v25  ;;  %v4159_v7 = vadd.f32 %v2413_v34, %v2407_v39 }
 0x347   :  { %v4161_v0 = vadd.f32 %v2413_v34, %v2408_v38  ;;  %v4163_v14 = vadd.f32 %v2413_v34, %v2409_v47  ;;  %vm2434_vm12 = vcmp.ge.f32.partialorder %v2415_v43, 0.0  ;;  %vm2435_vm13 = vcmp.ge.f32.partialorder %v2416_v56, 0.0 }
 0x348   :  { %vm2436_vm14 = vcmp.ge.f32.partialorder %v2417_v10, 0.0  ;;  %vm2437_vm15 = vcmp.ge.f32.partialorder %v2418_v12, 0.0  ;;  %vm2438_vm0 = vcmp.ge.f32.partialorder %v2419_v20, 0.0  ;;  %vm2439_vm1 = vcmp.ge.f32.partialorder %v2420_v35, 0.0 }
 0x349   :  { %vm2443_vm6 = vcmp.ge.f32.partialorder %v4145_v40, 0.0  ;;  %vm2444_vm7 = vcmp.ge.f32.partialorder %v4147_v3, 0.0  ;;  %vm2445_vm8 = vcmp.ge.f32.partialorder %v4149_v53, 0.0  ;;  %vm2446_vm9 = vcmp.ge.f32.partialorder %v4151_v24, 0.0 }
 0x34a   :  { %vm2447_vm10 = vcmp.ge.f32.partialorder %v4153_v36, 0.0  ;;  %vm2448_vm11 = vcmp.ge.f32.partialorder %v4155_v11, 0.0  ;;  %vm2449_vm3 = vcmp.ge.f32.partialorder %v4157_v48, 0.0  ;;  %vm2450_vm2 = vcmp.ge.f32.partialorder %v4159_v7, 0.0 }
 0x34b   :  { %vm2451_vm4 = vcmp.ge.f32.partialorder %v4161_v0, 0.0  ;;  %vm2452_vm5 = vcmp.ge.f32.partialorder %v4163_v14, 0.0  ;;  %v2453_v9 = vmul.f32 0.01, %v2415_v43  ;;  %v2454_v27 = vmul.f32 0.01, %v2416_v56 }
 0x34c   :  { %v2455_v13 = vmul.f32 0.01, %v2417_v10  ;;  %v2456_v37 = vmul.f32 0.01, %v2418_v12  ;;  %v2457_v18 = vmul.f32 0.01, %v2419_v20 }
 0x34d   :  { %v2458_v26 = vmul.f32 0.01, %v2420_v35  ;;  %v2459_v6 = vmul.f32 0.01, %v4139_v44  ;;  %v2460_v63 = vmul.f32 0.01, %v4141_v28  ;;  %v2472_v1 = vsel %vm2434_vm12, %v2415_v43, %v2453_v9 }
 0x34e   :  { %v2461_v46 = vmul.f32 0.01, %v4143_v17  ;;  %v2462_v22 = vmul.f32 0.01, %v4145_v40  ;;  %v2463_v62 = vmul.f32 0.01, %v4147_v3  ;;  %v2473_v33 = vsel %vm2435_vm13, %v2416_v56, %v2454_v27 }
 0x34f   :  { %2491 = vst [vmem:[#allocation6] sm:$0xff] %v2472_v1  ;;  %v2464_v60 = vmul.f32 0.01, %v4149_v53  ;;  %v2465_v49 = vmul.f32 0.01, %v4151_v24  ;;  %v2474_v4 = vsel %vm2436_vm14, %v2417_v10, %v2455_v13  ;;  %2492 = vst [vmem:[#allocation6 + $0x8] sm:$0xff] %v2473_v33  ;;  %v2475_v41 = vsel %vm2437_vm15, %v2418_v12, %v2456_v37 }
 0x350   :  { %v2466_v5 = vmul.f32 0.01, %v4153_v36  ;;  %v2467_v55 = vmul.f32 0.01, %v4155_v11  ;;  %v2468_v32 = vmul.f32 0.01, %v4157_v48  ;;  %v2476_v23 = vsel %vm2438_vm0, %v2419_v20, %v2457_v18 }
 0x351   :  { %v2469_v31 = vmul.f32 0.01, %v4159_v7  ;;  %2493 = vst [vmem:[#allocation6 + $0x10] sm:$0xff] %v2474_v4  ;;  %v2470_v8 = vmul.f32 0.01, %v4161_v0  ;;  %v2477_v19 = vsel %vm2439_vm1, %v2420_v35, %v2458_v26  ;;  %2494 = vst [vmem:[#allocation6 + $0x18] sm:$0xff] %v2475_v41  ;;  %v2481_v52 = vsel %vm2443_vm6, %v4145_v40, %v2462_v22 }
 0x352   :  { %v2471_v21 = vmul.f32 0.01, %v4163_v14  ;;  %vm4257_vm12 = vcmp.ge.f32.partialorder %v4139_v44, 0.0  ;;  %vm4258_vm13 = vcmp.ge.f32.partialorder %v4141_v28, 0.0  ;;  %vm4259_vm14 = vcmp.ge.f32.partialorder %v4143_v17, 0.0  ;;  %2495 = vst [vmem:[#allocation6 + $0x20] sm:$0xff] %v2476_v23 }
 0x353   :  { %v2478_v16 = vsel %vm4257_vm12, %v4139_v44, %v2459_v6  ;;  %v2479_v2 = vsel %vm4258_vm13, %v4141_v28, %v2460_v63  ;;  %v2480_v51 = vsel %vm4259_vm14, %v4143_v17, %v2461_v46  ;;  %2496 = vst [vmem:[#allocation6 + $0x28] sm:$0xff] %v2477_v19  ;;  %v2482_v30 = vsel %vm2444_vm7, %v4147_v3, %v2463_v62 }
 0x354   :  { %v2483_v57 = vsel %vm2445_vm8, %v4149_v53, %v2464_v60  ;;  %v2484_v61 = vsel %vm2446_vm9, %v4151_v24, %v2465_v49  ;;  %v2485_v29 = vsel %vm2447_vm10, %v4153_v36, %v2466_v5  ;;  %2497 = vst [vmem:[#allocation6 + $0x30] sm:$0xff] %v2478_v16  ;;  %2498 = vst [vmem:[#allocation6 + $0x38] sm:$0xff] %v2479_v2 }
 0x355   :  { %2499 = vst [vmem:[#allocation6 + $0x40] sm:$0xff] %v2480_v51  ;;  %2500 = vst [vmem:[#allocation6 + $0x48] sm:$0xff] %v2481_v52  ;;  %v2486_v54 = vsel %vm2448_vm11, %v4155_v11, %v2467_v55  ;;  %v2487_v58 = vsel %vm2449_vm3, %v4157_v48, %v2468_v32  ;;  %v2488_v59 = vsel %vm2450_vm2, %v4159_v7, %v2469_v31  ;;  %vm4260_vm3 = vcmask 64512  }
 0x356   :  { %v2489_v45 = vsel %vm2451_vm4, %v4161_v0, %v2470_v8  ;;  %2501 = vst [vmem:[#allocation6 + $0x50] sm:$0xff] %v2482_v30  ;;  %2502 = vst [vmem:[#allocation6 + $0x58] sm:$0xff] %v2483_v57  ;;  %v2490_v42 = vsel %vm2452_vm5, %v4163_v14, %v2471_v21 }
 0x357   :  { %2503 = vst [vmem:[#allocation6 + $0x60] sm:$0xff] %v2484_v61  ;;  %2504 = vst [vmem:[#allocation6 + $0x68] sm:$0xff] %v2485_v29 }
 0x358   :  { %2505 = vst [vmem:[#allocation6 + $0x70] sm:$0xff] %v2486_v54  ;;  %2506 = vst [vmem:[#allocation6 + $0x78] sm:$0xff] %v2487_v58 }
 0x359   :  { %2507 = vst [vmem:[#allocation6 + $0x80] sm:$0xff] %v2488_v59  ;;  %2508 = vst [vmem:[#allocation6 + $0x88] sm:$0xff] %v2489_v45 }
 0x35a   :  { %2509 = vst.msk [vmem:[#allocation6 + $0x90] sm:$0xff] %vm4260_vm3, %v2490_v42 }
 0x35b   :  { %3135 = shalt.err (!%p3132_p12)
}
 0x35c   :  { %s3136_s30 = scalar_lea.hbm %s4255_s6, 2432 }
 0x35d   :  { %p3137_p13 = scmp.ne.s32.totalorder %s4255_s6, %s3136_s30  ;;  %p3140_p0 = scmp.lt.u32.totalorder %s3136_s30, %s4255_s6 }
 0x35f   :  { %p3142_p1 = pnand %p3140_p0, %p3137_p13 }
 0x361   :  { %3145 = shalt.err (!%p3142_p1)
}
 0x362   :  { %2519 = dma.vmem_to_hbm [thread:$0]  %s2517_s4, 2432, %s4255_s6, [#allocation5]  }
 0x363   :  { %3148 = dma.done.wait [#allocation5], 2432  }
 0x364   :  { %3149 = vsyncadd [#allocation5], 4294964864 }
 0x365   :  { %2523 = vsyncpa [#allocation4], 1 }
 0x366   :  { %2524 = vsyncpa [#allocation5], 1 }

</bundles_post_ra>
